<compile_context>
chip_gen: v7x
topology: tpu7x:2x2x1
jax: 0.10.0
libtpu: 0.0.40
codegen_flags: <defaults>
</compile_context>

<pallas_src>
import functools
import math

import jax
import jax.numpy as jnp
from jax import lax
from jax.experimental import pallas as pl
from jax.experimental.pallas import tpu as pltpu


def _ms_loss_kernel(emb_q_ref, emb_k_ref, lab_q_ref, lab_k_ref, out_ref,
                    pos_acc, neg_acc, *,
                    alpha: float, beta: float, base: float,
                    tile: int, n_valid: int, b_pad: int):
    i = pl.program_id(0)          # query-row tile (parallel)
    k = pl.program_id(1)          # key-col tile   (arbitrary / reduction)
    nk = pl.num_programs(1)

    # ---- init: zero the element-wise accumulators once per row tile ----
    @pl.when(k == 0)
    def _():
        pos_acc[...] = jnp.zeros_like(pos_acc)
        neg_acc[...] = jnp.zeros_like(neg_acc)

    # ---- similarity tile on the MXU (inputs are pre-normalized f32) ----
    # Contract the last dims of both operands: no explicit .T, no XLU transpose.
    sim = lax.dot_general(
        emb_q_ref[...], emb_k_ref[...],
        dimension_numbers=(((1,), (1,)), ((), ())),
        preferred_element_type=jnp.float32)                     # (tile, tile)

    # ---- masks ----
    eq = lab_q_ref[...] == lab_k_ref[...]                       # (tile,1)==(1,tile)

    # Diagonal only exists on i == k tiles (wrapper enforces tm == tk == tile).
    local_diag = (lax.broadcasted_iota(jnp.int32, (tile, tile), 0)
                  == lax.broadcasted_iota(jnp.int32, (tile, tile), 1))
    diag = jnp.logical_and(local_diag, i == k)

    pos_mask = jnp.logical_and(eq, jnp.logical_not(diag))
    neg_mask = jnp.logical_not(eq)

    if n_valid != b_pad:
        # Only emitted when the batch is actually padded.
        col_ids = lax.broadcasted_iota(jnp.int32, (tile, tile), 1) + k * tile
        valid = col_ids < n_valid
        pos_mask = jnp.logical_and(pos_mask, valid)
        neg_mask = jnp.logical_and(neg_mask, valid)

    # ---- element-wise accumulation; `- base` folded into finalize scaling ----
    pos_acc[...] += jnp.where(pos_mask, jnp.exp(-alpha * sim), 0.0)
    neg_acc[...] += jnp.where(neg_mask, jnp.exp(beta * sim), 0.0)

    # ---- finalize: single cross-lane reduce + per-row loss, lane-dense write ----
    @pl.when(k == nk - 1)
    def _():
        pos_sum = jnp.sum(pos_acc[...], axis=1)[None, :]        # (1, tile)
        neg_sum = jnp.sum(neg_acc[...], axis=1)[None, :]        # (1, tile)
        pos_scale = math.exp(alpha * base)                      # exp(-a*(s-b)) = e^{ab} e^{-as}
        neg_scale = math.exp(-beta * base)                      # exp( b*(s-b)) = e^{-bb} e^{bs}
        out_ref[...] = ((1.0 / alpha) * jnp.log(1.0 + pos_scale * pos_sum)
                        + (1.0 / beta) * jnp.log(1.0 + neg_scale * neg_sum))


def multi_similarity_loss(embeddings, labels, *, alpha=2.0, beta=50.0, base=0.5,
                          tile=512):
    """embeddings: (B, D) float, labels: (B,) int.  Returns scalar float32.

    `tile` is the (square) query/key tile size; 512 is a good default on
    v5e/v6e, 256-512 on v7x depending on D.  It is clamped down automatically
    for small batches and must be a multiple of 128.
    """
    B, D = embeddings.shape

    # L2-normalize ONCE in the wrapper (rsqrt * mul) -- the kernel reads the
    # key stream nq times, so normalizing inside the kernel is nq-x redundant.
    x = embeddings.astype(jnp.float32)
    sq = jnp.sum(x * x, axis=1, keepdims=True)
    xn = x * lax.rsqrt(jnp.maximum(sq, 1e-24))   # == x / max(||x||, 1e-12)

    # Clamp the tile to the 128-rounded batch so tiny inputs don't pad to 512.
    tile = max(128, min(int(tile), pl.cdiv(B, 128) * 128))
    assert tile % 128 == 0, "tile must be a multiple of 128"
    B_pad = pl.cdiv(B, tile) * tile

    lab = labels.astype(jnp.int32)
    if B_pad != B:
        xn = jnp.pad(xn, ((0, B_pad - B), (0, 0)))               # zero rows
        lab = jnp.pad(lab, (0, B_pad - B), constant_values=-1)
    lab_col = lab.reshape(B_pad, 1)
    lab_row = lab.reshape(1, B_pad)

    nq = B_pad // tile
    nk = B_pad // tile

    kernel = functools.partial(
        _ms_loss_kernel, alpha=float(alpha), beta=float(beta), base=float(base),
        tile=tile, n_valid=B, b_pad=B_pad)

    per_row = pl.pallas_call(
        kernel,
        out_shape=jax.ShapeDtypeStruct((1, B_pad), jnp.float32),
        grid_spec=pltpu.PrefetchScalarGridSpec(
            num_scalar_prefetch=0,
            grid=(nq, nk),
            in_specs=[
                pl.BlockSpec((tile, D), lambda i, k: (i, 0)),   # query tile (held over k)
                pl.BlockSpec((tile, D), lambda i, k: (k, 0)),   # key tile (pipelined)
                pl.BlockSpec((tile, 1), lambda i, k: (i, 0)),   # labels (column view)
                pl.BlockSpec((1, tile), lambda i, k: (0, k)),   # labels (row view)
            ],
            out_specs=pl.BlockSpec((1, tile), lambda i, k: (0, i)),  # lane-dense rows
            scratch_shapes=[
                pltpu.VMEM((tile, tile), jnp.float32),   # pos element-wise accumulator
                pltpu.VMEM((tile, tile), jnp.float32),   # neg element-wise accumulator
            ],
        ),
        compiler_params=pltpu.CompilerParams(
            dimension_semantics=("parallel", "arbitrary"),
            vmem_limit_bytes=64 * 1024 * 1024),
        cost_estimate=pl.CostEstimate(
            flops=2 * B_pad * B_pad * D,
            transcendentals=2 * B_pad * B_pad,
            # key stream is re-read nq times; query stream once; labels + out.
            bytes_accessed=4 * (B_pad * D + nq * B_pad * D + 3 * B_pad)),
    )(xn, xn, lab_col, lab_row)

    # Mean over the real (unpadded) rows is a trivial XLA reduction.
    return jnp.sum(per_row[0, :B]) / B


def _reference_loss(embeddings, labels, alpha=2.0, beta=50.0, base=0.5):
    x = embeddings.astype(jnp.float32)
    xn = x / jnp.maximum(jnp.linalg.norm(x, axis=1, keepdims=True), 1e-12)
    sim = xn @ xn.T
    eq = (labels[None, :] == labels[:, None]).astype(jnp.float32)
    pos_mask = eq - jnp.eye(labels.shape[0], dtype=jnp.float32)
    neg_mask = 1.0 - eq
    pos_loss = (1.0 / alpha) * jnp.log(
        1.0 + jnp.sum(jnp.exp(-alpha * (sim - base)) * pos_mask, axis=1))
    neg_loss = (1.0 / beta) * jnp.log(
        1.0 + jnp.sum(jnp.exp(beta * (sim - base)) * neg_mask, axis=1))
    return jnp.mean(pos_loss + neg_loss)


if __name__ == "__main__":
    B, D = 8, 32
    key = jax.random.PRNGKey(0)
    k_emb, k_lab = jax.random.split(key)
    embeddings = jax.random.normal(k_emb, (B, D), dtype=jnp.float32)
    labels = jax.random.randint(k_lab, (B,), 0, 3, dtype=jnp.int32)

    loss = multi_similarity_loss(embeddings, labels)
    jax.block_until_ready(loss)

    ref = _reference_loss(embeddings, labels)
    assert jnp.allclose(loss, ref, rtol=1e-5, atol=1e-5), (loss, ref)
    print("KERNEL_OK")
</pallas_src>

<mosaic_0001>
module attributes {stable_mosaic.version = 11 : i64} {
  func.func @_ms_loss_kernel(%arg0: i32, %arg1: i32, %arg2: memref<128x32xf32, #tpu.memory_space<vmem>>, %arg3: memref<128x32xf32, #tpu.memory_space<vmem>>, %arg4: memref<128x1xi32, #tpu.memory_space<vmem>>, %arg5: memref<1x128xi32, #tpu.memory_space<vmem>>, %arg6: memref<1x128xf32, #tpu.memory_space<vmem>>, %arg7: memref<128x128xf32, #tpu.memory_space<vmem>>, %arg8: memref<128x128xf32, #tpu.memory_space<vmem>>) attributes {dimension_semantics = [#tpu.dimension_semantics<parallel>, #tpu.dimension_semantics<arbitrary>], iteration_bounds = array<i64: 1, 1>, scalar_prefetch = 0 : i64, scratch_operands = 2 : i64, tpu.core_type = #tpu.core_type<tc>, window_params = [{transform_indices = @transform_0, window_bounds = array<i64: 128, 32>}, {transform_indices = @transform_1, window_bounds = array<i64: 128, 32>}, {transform_indices = @transform_2, window_bounds = array<i64: 128, 1>}, {transform_indices = @transform_3, window_bounds = array<i64: 1, 128>}, {transform_indices = @transform_4, window_bounds = array<i64: 1, 128>}]} {
    %c0_i32 = arith.constant 0 : i32
    %0 = arith.cmpi eq, %arg1, %c0_i32 : i32
    %1 = arith.extui %0 : i1 to i32
    %c0_i32_0 = arith.constant 0 : i32
    %2 = arith.cmpi ne, %1, %c0_i32_0 : i32
    scf.if %2 {
      %cst_24 = arith.constant 0.000000e+00 : f32
      %47 = vector.broadcast %cst_24 : f32 to vector<128x128xf32>
      %c0_25 = arith.constant 0 : index
      %c0_26 = arith.constant 0 : index
      %48 = vector.load %arg7[%c0_25, %c0_26] : memref<128x128xf32, #tpu.memory_space<vmem>>, vector<128x128xf32>
      tpu.vector_store %arg7[%c0_25, %c0_26], %47 {strides = array<i32>} : memref<128x128xf32, #tpu.memory_space<vmem>>, vector<128x128xf32>,
      %cst_27 = arith.constant 0.000000e+00 : f32
      %49 = vector.broadcast %cst_27 : f32 to vector<128x128xf32>
      %c0_28 = arith.constant 0 : index
      %c0_29 = arith.constant 0 : index
      %50 = vector.load %arg8[%c0_28, %c0_29] : memref<128x128xf32, #tpu.memory_space<vmem>>, vector<128x128xf32>
      tpu.vector_store %arg8[%c0_28, %c0_29], %49 {strides = array<i32>} : memref<128x128xf32, #tpu.memory_space<vmem>>, vector<128x128xf32>,
    } else {
    }
    %c0 = arith.constant 0 : index
    %c0_1 = arith.constant 0 : index
    %3 = vector.load %arg2[%c0, %c0_1] : memref<128x32xf32, #tpu.memory_space<vmem>>, vector<128x32xf32>
    %c0_2 = arith.constant 0 : index
    %c0_3 = arith.constant 0 : index
    %4 = vector.load %arg3[%c0_2, %c0_3] : memref<128x32xf32, #tpu.memory_space<vmem>>, vector<128x32xf32>
    %cst = arith.constant dense<0.000000e+00> : vector<128x128xf32>
    %5 = tpu.matmul %3, %4, %cst {dimension_numbers = #tpu.dot_dimension_numbers<[1], [1], [0], [0], [0, 0, 1, 0], [], []>} : vector<128x32xf32>, vector<128x32xf32>, vector<128x128xf32> -> vector<128x128xf32>
    %c0_4 = arith.constant 0 : index
    %c0_5 = arith.constant 0 : index
    %6 = vector.load %arg4[%c0_4, %c0_5] : memref<128x1xi32, #tpu.memory_space<vmem>>, vector<128x1xi32>
    %c0_6 = arith.constant 0 : index
    %c0_7 = arith.constant 0 : index
    %7 = vector.load %arg5[%c0_6, %c0_7] : memref<1x128xi32, #tpu.memory_space<vmem>>, vector<1x128xi32>
    %8 = vector.broadcast %6 : vector<128x1xi32> to vector<128x128xi32>
    %9 = vector.broadcast %7 : vector<1x128xi32> to vector<128x128xi32>
    %10 = arith.cmpi eq, %8, %9 : vector<128x128xi32>
    %11 = tpu.iota {dimensions = array<i32: 0>} : vector<128x128xi32>
    %12 = tpu.iota {dimensions = array<i32: 1>} : vector<128x128xi32>
    %13 = arith.cmpi eq, %11, %12 : vector<128x128xi32>
    %14 = arith.cmpi eq, %arg0, %arg1 : i32
    %15 = vector.broadcast %14 : i1 to vector<128x128xi1>
    %16 = arith.andi %13, %15 : vector<128x128xi1>
    %cst_8 = arith.constant dense<true> : vector<128x128xi1>
    %17 = arith.xori %16, %cst_8 : vector<128x128xi1>
    %18 = arith.andi %10, %17 : vector<128x128xi1>
    %cst_9 = arith.constant dense<true> : vector<128x128xi1>
    %19 = arith.xori %10, %cst_9 : vector<128x128xi1>
    %20 = tpu.iota {dimensions = array<i32: 1>} : vector<128x128xi32>
    %c128_i32 = arith.constant 128 : i32
    %21 = arith.muli %arg1, %c128_i32 : i32
    %22 = vector.broadcast %21 : i32 to vector<128x128xi32>
    %23 = arith.addi %20, %22 : vector<128x128xi32>
    %c8_i32 = arith.constant 8 : i32
    %24 = vector.broadcast %c8_i32 : i32 to vector<128x128xi32>
    %25 = arith.cmpi slt, %23, %24 : vector<128x128xi32>
    %26 = arith.andi %18, %25 : vector<128x128xi1>
    %27 = arith.andi %19, %25 : vector<128x128xi1>
    %c0_10 = arith.constant 0 : index
    %c0_11 = arith.constant 0 : index
    %28 = vector.load %arg7[%c0_10, %c0_11] : memref<128x128xf32, #tpu.memory_space<vmem>>, vector<128x128xf32>
    %cst_12 = arith.constant -2.000000e+00 : f32
    %29 = vector.broadcast %cst_12 : f32 to vector<128x128xf32>
    %30 = arith.mulf %29, %5 : vector<128x128xf32>
    %31 = math.exp %30 : vector<128x128xf32>
    %cst_13 = arith.constant 0.000000e+00 : f32
    %32 = vector.broadcast %cst_13 : f32 to vector<128x128xf32>
    %33 = arith.select %26, %31, %32 : vector<128x128xi1>, vector<128x128xf32>
    %34 = arith.addf %28, %33 : vector<128x128xf32>
    %c0_14 = arith.constant 0 : index
    %c0_15 = arith.constant 0 : index
    %35 = vector.load %arg7[%c0_14, %c0_15] : memref<128x128xf32, #tpu.memory_space<vmem>>, vector<128x128xf32>
    tpu.vector_store %arg7[%c0_14, %c0_15], %34 {strides = array<i32>} : memref<128x128xf32, #tpu.memory_space<vmem>>, vector<128x128xf32>,
    %c0_16 = arith.constant 0 : index
    %c0_17 = arith.constant 0 : index
    %36 = vector.load %arg8[%c0_16, %c0_17] : memref<128x128xf32, #tpu.memory_space<vmem>>, vector<128x128xf32>
    %cst_18 = arith.constant 5.000000e+01 : f32
    %37 = vector.broadcast %cst_18 : f32 to vector<128x128xf32>
    %38 = arith.mulf %37, %5 : vector<128x128xf32>
    %39 = math.exp %38 : vector<128x128xf32>
    %cst_19 = arith.constant 0.000000e+00 : f32
    %40 = vector.broadcast %cst_19 : f32 to vector<128x128xf32>
    %41 = arith.select %27, %39, %40 : vector<128x128xi1>, vector<128x128xf32>
    %42 = arith.addf %36, %41 : vector<128x128xf32>
    %c0_20 = arith.constant 0 : index
    %c0_21 = arith.constant 0 : index
    %43 = vector.load %arg8[%c0_20, %c0_21] : memref<128x128xf32, #tpu.memory_space<vmem>>, vector<128x128xf32>
    tpu.vector_store %arg8[%c0_20, %c0_21], %42 {strides = array<i32>} : memref<128x128xf32, #tpu.memory_space<vmem>>, vector<128x128xf32>,
    %c0_i32_22 = arith.constant 0 : i32
    %44 = arith.cmpi eq, %arg1, %c0_i32_22 : i32
    %45 = arith.extui %44 : i1 to i32
    %c0_i32_23 = arith.constant 0 : i32
    %46 = arith.cmpi ne, %45, %c0_i32_23 : i32
    scf.if %46 {
      %c0_24 = arith.constant 0 : index
      %c0_25 = arith.constant 0 : index
      %47 = vector.load %arg7[%c0_24, %c0_25] : memref<128x128xf32, #tpu.memory_space<vmem>>, vector<128x128xf32>
      %cst_26 = arith.constant dense<0.000000e+00> : vector<128xf32>
      %48 = vector.multi_reduction <add>, %47, %cst_26 [1] : vector<128x128xf32> to vector<128xf32>
      %49 = vector.shape_cast %48 : vector<128xf32> to vector<1x128xf32>
      %c0_27 = arith.constant 0 : index
      %c0_28 = arith.constant 0 : index
      %50 = vector.load %arg8[%c0_27, %c0_28] : memref<128x128xf32, #tpu.memory_space<vmem>>, vector<128x128xf32>
      %cst_29 = arith.constant dense<0.000000e+00> : vector<128xf32>
      %51 = vector.multi_reduction <add>, %50, %cst_29 [1] : vector<128x128xf32> to vector<128xf32>
      %52 = vector.shape_cast %51 : vector<128xf32> to vector<1x128xf32>
      %cst_30 = arith.constant 2.71828175 : f32
      %53 = vector.broadcast %cst_30 : f32 to vector<1x128xf32>
      %54 = arith.mulf %53, %49 : vector<1x128xf32>
      %cst_31 = arith.constant 1.000000e+00 : f32
      %55 = vector.broadcast %cst_31 : f32 to vector<1x128xf32>
      %56 = arith.addf %55, %54 : vector<1x128xf32>
      %57 = math.log %56 : vector<1x128xf32>
      %cst_32 = arith.constant 5.000000e-01 : f32
      %58 = vector.broadcast %cst_32 : f32 to vector<1x128xf32>
      %59 = arith.mulf %58, %57 : vector<1x128xf32>
      %cst_33 = arith.constant 1.38879437E-11 : f32
      %60 = vector.broadcast %cst_33 : f32 to vector<1x128xf32>
      %61 = arith.mulf %60, %52 : vector<1x128xf32>
      %cst_34 = arith.constant 1.000000e+00 : f32
      %62 = vector.broadcast %cst_34 : f32 to vector<1x128xf32>
      %63 = arith.addf %62, %61 : vector<1x128xf32>
      %64 = math.log %63 : vector<1x128xf32>
      %cst_35 = arith.constant 2.000000e-02 : f32
      %65 = vector.broadcast %cst_35 : f32 to vector<1x128xf32>
      %66 = arith.mulf %65, %64 : vector<1x128xf32>
      %67 = arith.addf %59, %66 : vector<1x128xf32>
      %c0_36 = arith.constant 0 : index
      %c0_37 = arith.constant 0 : index
      %68 = vector.load %arg6[%c0_36, %c0_37] : memref<1x128xf32, #tpu.memory_space<vmem>>, vector<1x128xf32>
      tpu.vector_store %arg6[%c0_36, %c0_37], %67 {strides = array<i32>} : memref<1x128xf32, #tpu.memory_space<vmem>>, vector<1x128xf32>,
    } else {
    }
    return
  }
  func.func @transform_0(%arg0: i32, %arg1: i32) -> (i32, i32) {
    %c0_i32 = arith.constant 0 : i32
    %c0_i32_0 = arith.constant 0 : i32
    return %arg0, %c0_i32 : i32, i32
  }
  func.func @transform_1(%arg0: i32, %arg1: i32) -> (i32, i32) {
    %c0_i32 = arith.constant 0 : i32
    %c0_i32_0 = arith.constant 0 : i32
    return %arg1, %c0_i32 : i32, i32
  }
  func.func @transform_2(%arg0: i32, %arg1: i32) -> (i32, i32) {
    %c0_i32 = arith.constant 0 : i32
    %c0_i32_0 = arith.constant 0 : i32
    return %arg0, %c0_i32 : i32, i32
  }
  func.func @transform_3(%arg0: i32, %arg1: i32) -> (i32, i32) {
    %c0_i32 = arith.constant 0 : i32
    %c0_i32_0 = arith.constant 0 : i32
    return %c0_i32, %arg1 : i32, i32
  }
  func.func @transform_4(%arg0: i32, %arg1: i32) -> (i32, i32) {
    %c0_i32 = arith.constant 0 : i32
    %c0_i32_0 = arith.constant 0 : i32
    return %c0_i32, %arg0 : i32, i32
  }
}

</mosaic_0001>

<bundles_post_ra>
// kernel: tpu_custom_call.1
= control target key start
LH: loop header
LB: loop body
LE: loop exit
PB: predicated region body
PF: predicated region fallthrough
CT: control target
= control target key end

     0   :  { %9 = vsyncpa [#allocation5], 0  ;;  %s2662_s0 = inlined_call_operand.hbm [shape: f32[128,32], index: 0, kind: input, shape index: {}]   ;;  %s2663_s1 = inlined_call_operand.hbm [shape: f32[128,32], index: 1, kind: input, shape index: {}]   ;;  %s2664_s2 = inlined_call_operand.hbm [shape: s32[128,1], index: 2, kind: input, shape index: {}]   ;;  %s2665_s3 = inlined_call_operand.hbm [shape: s32[1,128], index: 3, kind: input, shape index: {}]   ;;  %s2666_s4 = inlined_call_operand.hbm [shape: f32[1,128], index: 4, kind: output, shape index: {}]  }
   0x1   :  { %10 = vsyncpa [#allocation8], 0 }
   0x2   :  { %11 = vsyncpa [#allocation11], 0 }
   0x3   :  { %12 = vsyncpa [#allocation6], 0  ;;  %s1690_s15 = smov [#allocation7]   ;;  %s1691_s17 = smov [#allocation4]  }
   0x4   :  { %s30_s16 = sshll.u32 %s1690_s15, 4  ;;  %s18_s18 = sshll.u32 %s1691_s17, 4  ;;  %s31_s16 = int_to_ptr.vmem [resolvable:$true] %s30_s16  ;;  %s1724_s18 = int_to_ptr.vmem [resolvable:$true] %s18_s18 }
   0x5   :  { %s1572_s21 = scalar_lea.hbm %s2663_s1, 2048 }
   0x6   :  { %p1573_p0 = scmp.ne.s32.totalorder %s2663_s1, %s1572_s21  ;;  %p1576_p1 = scmp.lt.u32.totalorder %s1572_s21, %s2663_s1 }
   0x8   :  { %p1578_p2 = pnand %p1576_p1, %p1573_p0 }
   0xa   :  { %1581 = shalt.err (!%p1578_p2)
}
   0xb   :  { %s1582_s26 = scalar_lea.vmem %s31_s16, 2048  ;;  %p1587_p4 = scmp.lt.s32.totalorder %s31_s16, %s31_s16 }
   0xc   :  { %p1583_p3 = scmp.ne.s32.totalorder %s31_s16, %s1582_s26  ;;  %p1588_p5 = scmp.lt.s32.totalorder %s1582_s26, %s1582_s26 }
   0xe   :  { %p1589_p6 = por %p1588_p5, %p1587_p4 }
  0x10   :  { %p1590_p7 = pnand %p1589_p6, %p1583_p3 }
  0x12   :  { %1593 = shalt.err (!%p1590_p7)
}
  0x13   :  { %s1692_s27 = smov 128   ;;  %s1693_s28 = smov 8  }
  0x14   :  { %36 = dma.hbm_to_vmem [thread:$0]  %s2663_s1, 2048, %s31_s16, [#allocation8], %s1692_s27, %s1692_s27, %s1693_s28  }
  0x15   :  { %s1594_s7 = scalar_lea.hbm %s2662_s0, 2048 }
  0x16   :  { %p1595_p8 = scmp.ne.s32.totalorder %s2662_s0, %s1594_s7  ;;  %p1598_p9 = scmp.lt.u32.totalorder %s1594_s7, %s2662_s0 }
  0x18   :  { %p1600_p10 = pnand %p1598_p9, %p1595_p8 }
  0x1a   :  { %1603 = shalt.err (!%p1600_p10)
}
  0x1b   :  { %s1604_s12 = scalar_lea.vmem %s1724_s18, 2048  ;;  %p1609_p12 = scmp.lt.s32.totalorder %s1724_s18, %s1724_s18 }
  0x1c   :  { %p1605_p11 = scmp.ne.s32.totalorder %s1724_s18, %s1604_s12  ;;  %p1610_p13 = scmp.lt.s32.totalorder %s1604_s12, %s1604_s12 }
  0x1e   :  { %p1611_p0 = por %p1610_p13, %p1609_p12 }
  0x20   :  { %p1612_p1 = pnand %p1611_p0, %p1605_p11 }
  0x22   :  { %1615 = shalt.err (!%p1612_p1)
}
  0x23   :  { %24 = dma.hbm_to_vmem [thread:$0]  %s2662_s0, 2048, %s1724_s18, [#allocation5], %s1692_s27, %s1692_s27, %s1693_s28  }
  0x24   :  { %s1694_s14 = smov [#allocation9]   ;;  %s1695_s16 = smov [#allocation10]  }
  0x25   :  { %s42_s15 = sshll.u32 %s1694_s14, 4  ;;  %s55_s17 = sshll.u32 %s1695_s16, 4  ;;  %s43_s15 = int_to_ptr.vmem [resolvable:$true] %s42_s15  ;;  %s56_s17 = int_to_ptr.vmem [resolvable:$true] %s55_s17 }
  0x26   :  { %s1616_s21 = scalar_lea.hbm %s2664_s2, 2048 }
  0x27   :  { %p1617_p2 = scmp.ne.s32.totalorder %s2664_s2, %s1616_s21  ;;  %p1620_p3 = scmp.lt.u32.totalorder %s1616_s21, %s2664_s2 }
  0x29   :  { %p1622_p4 = pnand %p1620_p3, %p1617_p2 }
  0x2b   :  { %1625 = shalt.err (!%p1622_p4)
}
  0x2c   :  { %s1626_s0 = scalar_lea.vmem %s43_s15, 2048  ;;  %p1631_p6 = scmp.lt.s32.totalorder %s43_s15, %s43_s15 }
  0x2d   :  { %p1627_p5 = scmp.ne.s32.totalorder %s43_s15, %s1626_s0  ;;  %p1632_p7 = scmp.lt.s32.totalorder %s1626_s0, %s1626_s0 }
  0x2f   :  { %p1633_p8 = por %p1632_p7, %p1631_p6 }
  0x31   :  { %p1634_p9 = pnand %p1633_p8, %p1627_p5 }
  0x33   :  { %1637 = shalt.err (!%p1634_p9)
}
  0x34   :  { %48 = dma.hbm_to_vmem [thread:$0]  %s2664_s2, 2048, %s43_s15, [#allocation8], %s1692_s27, %s1692_s27, %s1693_s28  }
  0x35   :  { %s1638_s5 = scalar_lea.hbm %s2665_s3, 16 }
  0x36   :  { %p1639_p10 = scmp.ne.s32.totalorder %s2665_s3, %s1638_s5  ;;  %p1642_p11 = scmp.lt.u32.totalorder %s1638_s5, %s2665_s3 }
  0x38   :  { %p1644_p12 = pnand %p1642_p11, %p1639_p10 }
  0x3a   :  { %1647 = shalt.err (!%p1644_p12)
}
  0x3b   :  { %s1648_s10 = scalar_lea.vmem %s56_s17, 16  ;;  %s1652_s11 = scalar_lea.vmem %s56_s17, 32 }
  0x3c   :  { %p1649_p13 = scmp.ne.s32.totalorder %s56_s17, %s1648_s10  ;;  %p1653_p0 = scmp.lt.s32.totalorder %s56_s17, %s56_s17 }
  0x3d   :  { %p1654_p1 = scmp.lt.s32.totalorder %s1652_s11, %s1648_s10 }
  0x3f   :  { %p1655_p2 = por %p1654_p1, %p1653_p0 }
  0x41   :  { %p1656_p3 = pnand %p1655_p2, %p1649_p13 }
  0x43   :  { %1659 = shalt.err (!%p1656_p3)
}
  0x44   :  { %58 = dma.hbm_to_vmem [thread:$0]  %s2665_s3, 16, %s56_s17, [#allocation11]  }
  0x45   :  { %1682 = dma.done.wait [#allocation5], 2048  }
  0x46   :  { %1683 = vsyncadd [#allocation5], 4294965248 }
  0x47   :  { %1684 = dma.done.wait [#allocation8], 4096  }
  0x48   :  { %1685 = vsyncadd [#allocation8], 4294963200 }
  0x49   :  { %1686 = dma.done.wait [#allocation11], 16  }
  0x4a   :  { %1687 = vsyncadd [#allocation11], 4294967280  ;;  %v1696_v0 = vmov 0   ;;  %vm139_vm0 = vcmask 261120   ;;  %v123_v2 = vld [vmem:[#allocation7] sm:$0xff]  ;;  %v124_v3 = vld [vmem:[#allocation7 + $0x8] sm:$0xff]  ;;  %v466_v61 = vlaneseq }
  0x4b   :  { %1443 = vset.pattern.permute.xlu1 %v1696_v0  ;;  %1442 = vset.pattern.permute.xlu0 %v1696_v0  ;;  %vm1790_vm1 = vmpackc.low %vm139_vm0, %vm139_vm0  ;;  %v125_v4 = vld [vmem:[#allocation7 + $0x10] sm:$0xff]  ;;  %v1369_v5 = vpack.c.bf16 %v124_v3, %v123_v2  ;;  %v126_v6 = vld [vmem:[#allocation7 + $0x18] sm:$0xff]  ;;  %vm2670_vm7 = vmmov 1   ;;  %s1698_s3 = smov [#allocation12]  }
  0x4c   :  { %v1375_v7 = vpack.c.bf16 %v126_v6, %v125_v4  ;;  %v107_v8 = vld [vmem:[#allocation4] sm:$0xff]  ;;  %v128_v11 = vld [vmem:[#allocation7 + $0x28] sm:$0xff]  ;;  %v383_v13 = vld [vmem:[#allocation9 + $0x10] sm:$0xff]  ;;  %s1237_s28 = sshll.u32 %s1698_s3, 4  ;;  %s1238_s28 = int_to_ptr.vmem [resolvable:$true] %s1237_s28 }
  0x4d   :  { %1371 = vmatprep.subr.msk.bf16.mxu0 %vm1790_vm1, %v1369_v5  ;;  %1417 = vmatprep.subr.msk.bf16.mxu1 %vm1790_vm1, %v1369_v5  ;;  %v115_v9 = vld [vmem:[#allocation4 + $0x40] sm:$0xff]  ;;  %v384_v15 = vld [vmem:[#allocation9 + $0x18] sm:$0xff]  ;;  %v129_v16 = vld [vmem:[#allocation7 + $0x30] sm:$0xff]  ;;  %s1660_s12 = scalar_lea.vmem %s1238_s28, 16  ;;  %s1664_s1 = scalar_lea.vmem %s1238_s28, 32 }
  0x4e   :  { %1374 = vmatpush3.bf16.xpose.msk.msra.mxu0 %vm1790_vm1, %v1369_v5  ;;  %1425 = vmatpush3.bf16.xpose.msk.msra.mxu1 %vm1790_vm1, %v1369_v5  ;;  %v127_v10 = vld [vmem:[#allocation7 + $0x20] sm:$0xff]  ;;  %v130_v17 = vld [vmem:[#allocation7 + $0x38] sm:$0xff]  ;;  %v382_v18 = vld [vmem:[#allocation9 + $0x8] sm:$0xff]  ;;  %v1882_v5 = vshrl.u32 %v466_v61, 7  ;;  %p1661_p4 = scmp.ne.s32.totalorder %s1238_s28, %s1660_s12  ;;  %p1665_p5 = scmp.lt.s32.totalorder %s1238_s28, %s1238_s28 }
  0x4f   :  { %1377 = vmatprep.subr.msk.bf16.mxu0 %vm1790_vm1, %v1375_v7  ;;  %1418 = vmatprep.subr.msk.bf16.mxu1 %vm1790_vm1, %v1375_v7  ;;  %v1381_v12 = vpack.c.bf16 %v128_v11, %v127_v10  ;;  %v381_v14 = vld [vmem:[#allocation9] sm:$0xff]  ;;  %v386_v19 = vld [vmem:[#allocation9 + $0x28] sm:$0xff]  ;;  %v1387_v20 = vpack.c.bf16 %v130_v17, %v129_v16  ;;  %v388_v22 = vld [vmem:[#allocation9 + $0x38] sm:$0xff]  ;;  %p1666_p6 = scmp.lt.s32.totalorder %s1664_s1, %s1660_s12 }
  0x50   :  { %1345 = vmatprep.mubr.msk.f32.mxu0 %vm139_vm0, %v107_v8  ;;  %1357 = vmatprep.mubr.msk.f32.mxu1 %vm139_vm0, %v115_v9  ;;  %v385_v21 = vld [vmem:[#allocation9 + $0x20] sm:$0xff]  ;;  %v132_v24 = vld [vmem:[#allocation7 + $0x48] sm:$0xff]  ;;  %v387_v25 = vld [vmem:[#allocation9 + $0x30] sm:$0xff]  ;;  %v470_v16 = vadd.s32 24, %v1882_v5  ;;  %v468_v17 = vadd.s32 8, %v1882_v5 }
  0x51   :  { %405 = vperm.xlu1 %1443, %v383_v13   ;;  %399 = vperm.xlu0 %1442, %v381_v14   ;;  %v131_v23 = vld [vmem:[#allocation7 + $0x40] sm:$0xff]  ;;  %v390_v26 = vld [vmem:[#allocation9 + $0x48] sm:$0xff]  ;;  %v392_v29 = vld [vmem:[#allocation9 + $0x58] sm:$0xff]  ;;  %p1667_p7 = por %p1666_p6, %p1665_p5 }
  0x52   :  { %v1393_v27 = vpack.c.bf16 %v132_v24, %v131_v23  ;;  %v389_v28 = vld [vmem:[#allocation9 + $0x40] sm:$0xff]  ;;  %v133_v30 = vld [vmem:[#allocation7 + $0x50] sm:$0xff]  ;;  %v134_v31 = vld [vmem:[#allocation7 + $0x58] sm:$0xff]  ;;  %v475_v23 = vadd.s32 64, %v1882_v5 }
  0x53   :  { %v391_v32 = vld [vmem:[#allocation9 + $0x50] sm:$0xff]  ;;  %v394_v33 = vld [vmem:[#allocation9 + $0x68] sm:$0xff]  ;;  %v1399_v34 = vpack.c.bf16 %v134_v31, %v133_v30  ;;  %v393_v35 = vld [vmem:[#allocation9 + $0x60] sm:$0xff]  ;;  %v478_v31 = vadd.s32 88, %v1882_v5  ;;  %p1668_p8 = pnand %p1667_p7, %p1661_p4 }
  0x54   :  { %v396_v36 = vld [vmem:[#allocation9 + $0x78] sm:$0xff]  ;;  %v135_v37 = vld [vmem:[#allocation7 + $0x60] sm:$0xff]  ;;  %v136_v38 = vld [vmem:[#allocation7 + $0x68] sm:$0xff] }
  0x55   :  { %408 = vperm.xlu1 %1443, %v384_v15   ;;  %402 = vperm.xlu0 %1442, %v382_v18   ;;  %v395_v39 = vld [vmem:[#allocation9 + $0x70] sm:$0xff]  ;;  %v1405_v40 = vpack.c.bf16 %v136_v38, %v135_v37  ;;  %v138_v42 = vld [vmem:[#allocation7 + $0x78] sm:$0xff]  ;;  %v108_v44 = vld [vmem:[#allocation4 + $0x8] sm:$0xff]  ;;  %v1894_v15 = vand.u32 127, %v466_v61  ;;  %v476_v18 = vadd.s32 72, %v1882_v5 }
  0x56   :  { %1380 = vmatpush3.bf16.xpose.msk.msra.mxu0 %vm1790_vm1, %v1375_v7  ;;  %1426 = vmatpush3.bf16.xpose.msk.msra.mxu1 %vm1790_vm1, %v1375_v7  ;;  %v137_v41 = vld [vmem:[#allocation7 + $0x70] sm:$0xff]  ;;  %v116_v45 = vld [vmem:[#allocation4 + $0x48] sm:$0xff]  ;;  %v110_v48 = vld [vmem:[#allocation4 + $0x18] sm:$0xff] }
  0x57   :  { %1383 = vmatprep.subr.msk.bf16.mxu0 %vm1790_vm1, %v1381_v12  ;;  %1419 = vmatprep.subr.msk.bf16.mxu1 %vm1790_vm1, %v1381_v12  ;;  %v1411_v43 = vpack.c.bf16 %v138_v42, %v137_v41  ;;  %v109_v46 = vld [vmem:[#allocation4 + $0x10] sm:$0xff]  ;;  %v118_v49 = vld [vmem:[#allocation4 + $0x58] sm:$0xff]  ;;  %v111_v50 = vld [vmem:[#allocation4 + $0x20] sm:$0xff]  ;;  %vm488_vm2 = vcmp.eq.s32.totalorder %v470_v16, %v1894_v15  ;;  %vm485_vm3 = vcmp.eq.s32.totalorder %v1882_v5, %v1894_v15 }
  0x58   :  { %v117_v47 = vld [vmem:[#allocation4 + $0x50] sm:$0xff]  ;;  %v119_v51 = vld [vmem:[#allocation4 + $0x60] sm:$0xff]  ;;  %v112_v52 = vld [vmem:[#allocation4 + $0x28] sm:$0xff]  ;;  %vm486_vm4 = vcmp.eq.s32.totalorder %v468_v17, %v1894_v15  ;;  %vm494_vm5 = vcmp.eq.s32.totalorder %v476_v18, %v1894_v15  ;;  %vm493_vm6 = vcmp.eq.s32.totalorder %v475_v23, %v1894_v15  ;;  %v472_v23 = vadd.s32 40, %v1882_v5 }
  0x59   :  { %414 = vperm.xlu1 %1443, %v386_v19   ;;  %411 = vperm.xlu0 %1442, %v385_v21   ;;  %v120_v53 = vld [vmem:[#allocation4 + $0x68] sm:$0xff]  ;;  %v113_v54 = vld [vmem:[#allocation4 + $0x30] sm:$0xff]  ;;  %v114_v56 = vld [vmem:[#allocation4 + $0x38] sm:$0xff] }
  0x5a   :  { %v121_v55 = vld [vmem:[#allocation4 + $0x70] sm:$0xff]  ;;  %v122_v57 = vld [vmem:[#allocation4 + $0x78] sm:$0xff]  ;;  %vm1930_vm8 = vmxor %vm486_vm4, %vm2670_vm7 }
  0x5b   :  { %vm1945_vm11 = vmxor %vm485_vm3, %vm2670_vm7 }
  0x5c   :  { %vm1952_vm12 = vmxor %vm494_vm5, %vm2670_vm7  ;;  %vm2668_vm5 = vcmp.lt.s32.totalorder %v1894_v15, 8 }
  0x5d   :  { %420 = vperm.xlu1 %1443, %v388_v22   ;;  %417 = vperm.xlu0 %1442, %v387_v25   ;;  %vm1961_vm13 = vmxor %vm488_vm2, %vm2670_vm7 }
  0x5e   :  { %1386 = vmatpush3.bf16.xpose.msk.msra.mxu0 %vm1790_vm1, %v1381_v12  ;;  %1427 = vmatpush3.bf16.xpose.msk.msra.mxu1 %vm1790_vm1, %v1381_v12  ;;  %vm1969_vm15 = vmxor %vm493_vm6, %vm2670_vm7 }
  0x5f   :  { %1389 = vmatprep.subr.msk.bf16.mxu0 %vm1790_vm1, %v1387_v20  ;;  %1420 = vmatprep.subr.msk.bf16.mxu1 %vm1790_vm1, %v1387_v20 }
  0x61   :  { %426 = vperm.xlu1 %1443, %v390_v26   ;;  %423 = vperm.xlu0 %1442, %v389_v28   ;;  %v469_v26 = vadd.s32 16, %v1882_v5 }
  0x63   :  { %vm487_vm10 = vcmp.eq.s32.totalorder %v469_v26, %v1894_v15 }
  0x64   :  { %vm1995_vm3 = vmxor %vm487_vm10, %vm2670_vm7 }
  0x65   :  { %432 = vperm.xlu1 %1443, %v392_v29   ;;  %429 = vperm.xlu0 %1442, %v391_v32  }
  0x66   :  { %1392 = vmatpush3.bf16.xpose.msk.msra.mxu0 %vm1790_vm1, %v1387_v20  ;;  %1428 = vmatpush3.bf16.xpose.msk.msra.mxu1 %vm1790_vm1, %v1387_v20 }
  0x67   :  { %1395 = vmatprep.subr.msk.bf16.mxu0 %vm1790_vm1, %v1393_v27  ;;  %1421 = vmatprep.subr.msk.bf16.mxu1 %vm1790_vm1, %v1393_v27 }
  0x69   :  { %438 = vperm.xlu1 %1443, %v394_v33   ;;  %435 = vperm.xlu0 %1442, %v393_v35   ;;  %v1921_v35 = vld [vmem:[#allocation10] ss:$0 sm:$0xff] }
  0x6d   :  { %444 = vperm.xlu1 %1443, %v396_v36   ;;  %441 = vperm.xlu0 %1442, %v395_v39  }
  0x6e   :  { %1398 = vmatpush3.bf16.xpose.msk.msra.mxu0 %vm1790_vm1, %v1393_v27  ;;  %1429 = vmatpush3.bf16.xpose.msk.msra.mxu1 %vm1790_vm1, %v1393_v27 }
  0x6f   :  { %1401 = vmatprep.subr.msk.bf16.mxu0 %vm1790_vm1, %v1399_v34  ;;  %1422 = vmatprep.subr.msk.bf16.mxu1 %vm1790_vm1, %v1399_v34 }
  0x76   :  { %1404 = vmatpush3.bf16.xpose.msk.msra.mxu0 %vm1790_vm1, %v1399_v34  ;;  %1430 = vmatpush3.bf16.xpose.msk.msra.mxu1 %vm1790_vm1, %v1399_v34 }
  0x77   :  { %1407 = vmatprep.subr.msk.bf16.mxu0 %vm1790_vm1, %v1405_v40  ;;  %1423 = vmatprep.subr.msk.bf16.mxu1 %vm1790_vm1, %v1405_v40 }
  0x7e   :  { %1410 = vmatpush3.bf16.xpose.msk.msra.mxu0 %vm1790_vm1, %v1405_v40  ;;  %1431 = vmatpush3.bf16.xpose.msk.msra.mxu1 %vm1790_vm1, %v1405_v40 }
  0x7f   :  { %1413 = vmatprep.subr.msk.bf16.mxu0 %vm1790_vm1, %v1411_v43  ;;  %1424 = vmatprep.subr.msk.bf16.mxu1 %vm1790_vm1, %v1411_v43 }
  0x86   :  { %1416 = vmatpush3.bf16.xpose.msk.msra.mxu0 %vm1790_vm1, %v1411_v43  ;;  %1432 = vmatpush3.bf16.xpose.msk.msra.mxu1 %vm1790_vm1, %v1411_v43  ;;  %vm496_vm1 = vcmp.eq.s32.totalorder %v478_v31, %v1894_v15 }
  0x87   :  { %vm2011_vm6 = vmxor %vm496_vm1, %vm2670_vm7 }
  0x8d   :  { %1346 = vmatmul.mubr.msk.f32.vlgmr.msra.gmra.mrb[0].mxu0 %vm139_vm0, %v108_v44  ;;  %1358 = vmatmul.mubr.msk.f32.vlgmr.msra.gmra.mrb[0].mxu1 %vm139_vm0, %v116_v45 }
  0x8e   :  { %1348 = vmatprep.mubr.msk.f32.mxu0 %vm139_vm0, %v109_v46  ;;  %1360 = vmatprep.mubr.msk.f32.mxu1 %vm139_vm0, %v117_v47  ;;  %v473_v47 = vadd.s32 48, %v1882_v5 }
  0x91   :  { %1349 = vmatmul.mubr.msk.f32.gmra.mrb[2].mxu0 %vm139_vm0, %v110_v48  ;;  %1361 = vmatmul.mubr.msk.f32.gmra.mrb[2].mxu1 %vm139_vm0, %v118_v49 }
  0x92   :  { %1351 = vmatprep.mubr.msk.f32.mxu0 %vm139_vm0, %v111_v50  ;;  %1363 = vmatprep.mubr.msk.f32.mxu1 %vm139_vm0, %v119_v51 }
  0x95   :  { %1352 = vmatmul.mubr.msk.f32.gmra.mrb[4].mxu0 %vm139_vm0, %v112_v52  ;;  %1364 = vmatmul.mubr.msk.f32.gmra.mrb[4].mxu1 %vm139_vm0, %v120_v53 }
  0x96   :  { %1354 = vmatprep.mubr.msk.f32.mxu0 %vm139_vm0, %v113_v54  ;;  %1366 = vmatprep.mubr.msk.f32.mxu1 %vm139_vm0, %v121_v55 }
  0x99   :  { %1355 = vmatmul.mubr.msk.f32.gmra.mrb[6].mxu0 %vm139_vm0, %v114_v56  ;;  %1367 = vmatmul.mubr.msk.f32.gmra.mrb[6].mxu1 %vm139_vm0, %v122_v57 }
  0xd0   :  { %v1874_v58 = vpop.permute.xlu1 %405  ;;  %v1876_v59 = vpop.permute.xlu0 %399 }
  0xd4   :  { %v1878_v60 = vpop.permute.xlu1 %408  ;;  %v1880_v62 = vpop.permute.xlu0 %402 }
  0xd5   :  { %vm451_vm9 = vcmp.eq.s32.totalorder %v1880_v62, %v1921_v35  ;;  %v477_v62 = vadd.s32 80, %v1882_v5 }
  0xd6   :  { %vm1977_vm0 = vmxor %vm451_vm9, %vm2670_vm7 }
  0xd7   :  { %vm1988_vm2 = vmand %vm451_vm9, %vm1930_vm8 }
  0xd8   :  { %v1884_v6 = vpop.permute.xlu1 %414  ;;  %v1899_v19 = vpop.permute.xlu0 %411  ;;  %vm590_vm9 = vmand %vm1977_vm0, %vm2668_vm5  ;;  %vm450_vm0 = vcmp.eq.s32.totalorder %v1876_v59, %v1921_v35  ;;  %v480_v59 = vadd.s32 104, %v1882_v5 }
  0xd9   :  { %vm574_vm10 = vmand %vm1988_vm2, %vm2668_vm5 }
  0xdc   :  { %v1901_v22 = vpop.permute.xlu1 %420  ;;  %v1923_v36 = vpop.permute.xlu0 %417 }
  0xe0   :  { %v427_v44 = vpop.permute.xlu1 %426  ;;  %v2006_v61 = vpop.permute.xlu0 %423 }
  0xe1   :  { %vm459_vm14 = vcmp.eq.s32.totalorder %v427_v44, %v1921_v35  ;;  %vm2667_vm8 = vcmp.eq.s32.totalorder %v2006_v61, %v1921_v35 }
  0xe2   :  { %vm2002_vm4 = vmxor %vm459_vm14, %vm2670_vm7 }
  0xe3   :  { %vm2033_vm1 = vmand %vm459_vm14, %vm1952_vm12  ;;  %vm495_vm12 = vcmp.eq.s32.totalorder %v477_v62, %v1894_v15  ;;  %vm453_vm14 = vcmp.eq.s32.totalorder %v1878_v60, %v1921_v35 }
  0xe4   :  { %vm2044_vm2 = vmand %vm2667_vm8, %vm1969_vm15 }
  0xe5   :  { %vm2057_vm15 = vmand %vm2002_vm4, %vm2668_vm5 }
  0xe6   :  { %vm2072_vm4 = vmand %vm450_vm0, %vm1945_vm11 }
  0xe7   :  { %vm2095_vm11 = vmxor %vm495_vm12, %vm2670_vm7 }
  0xe8   :  { %vm2114_vm12 = vmxor %vm453_vm14, %vm2670_vm7 }
  0xe9   :  { %vm2137_vm8 = vmxor %vm450_vm0, %vm2670_vm7 }
 0x160   :  { %v1347_v63 = vpop.f32.mrb[0].mxu0  ;;  %v1359_v0 = vpop.f32.mrb[0].mxu1 }
 0x161   :  { %v622_v1 = vmul.f32 -2.0, %v1347_v63  ;;  %v734_v2 = vmul.f32 50.0, %v1347_v63  ;;  %v302_v3 = vpop.f32.mrb[1].mxu0  ;;  %v342_v4 = vpop.f32.mrb[1].mxu1  ;;  %v630_v8 = vmul.f32 -2.0, %v1359_v0  ;;  %v742_v10 = vmul.f32 50.0, %v1359_v0 }
 0x162   :  { %v621_v21 = vmul.f32 -2.0, %v302_v3  ;;  %v629_v25 = vmul.f32 -2.0, %v342_v4  ;;  %v733_v33 = vmul.f32 50.0, %v302_v3  ;;  %v741_v49 = vmul.f32 50.0, %v342_v4 }
 0x163   :  { %v639_v7 = vmul.f32 1.442695, %v622_v1  ;;  %v751_v9 = vmul.f32 1.442695, %v734_v2  ;;  %v655_v20 = vmul.f32 1.442695, %v630_v8  ;;  %v2022_v2 = vpop.permute.xlu1 %432 }
 0x164   :  { %v1886_v11 = vpop.f32.mrb[2].mxu0  ;;  %v1888_v12 = vpop.f32.mrb[2].mxu1  ;;  %v767_v24 = vmul.f32 1.442695, %v742_v10  ;;  %v637_v32 = vmul.f32 1.442695, %v621_v21 }
 0x165   :  { %v1890_v13 = vpop.f32.mrb[3].mxu0  ;;  %v1892_v14 = vpop.f32.mrb[3].mxu1  ;;  %1444 = vpow2.f32 %v639_v7  ;;  %v653_v37 = vmul.f32 1.442695, %v629_v25  ;;  %v624_v38 = vmul.f32 -2.0, %v1886_v11  ;;  %v632_v52 = vmul.f32 -2.0, %v1888_v12 }
 0x166   :  { %1446 = vpow2.f32 %v751_v9  ;;  %v749_v48 = vmul.f32 1.442695, %v733_v33  ;;  %v765_v0 = vmul.f32 1.442695, %v741_v49  ;;  %v736_v1 = vmul.f32 50.0, %v1886_v11 }
 0x167   :  { %1448 = vpow2.f32 %v655_v20  ;;  %v643_v51 = vmul.f32 1.442695, %v624_v38  ;;  %v659_v3 = vmul.f32 1.442695, %v632_v52  ;;  %v623_v4 = vmul.f32 -2.0, %v1890_v13  ;;  %v2090_v39 = vpop.permute.xlu1 %438 }
 0x168   :  { %v1905_v27 = vpop.f32.mrb[4].mxu0  ;;  %v1907_v28 = vpop.f32.mrb[4].mxu1  ;;  %1450 = vpow2.f32 %v767_v24  ;;  %v744_v17 = vmul.f32 50.0, %v1888_v12  ;;  %v755_v18 = vmul.f32 1.442695, %v736_v1  ;;  %v631_v24 = vmul.f32 -2.0, %v1892_v14 }
 0x169   :  { %v1914_v29 = vpop.f32.mrb[5].mxu0  ;;  %v1916_v30 = vpop.f32.mrb[5].mxu1  ;;  %1452 = vpow2.f32 %v637_v32  ;;  %v641_v12 = vmul.f32 1.442695, %v623_v4  ;;  %v471_v38 = vadd.s32 32, %v1882_v5  ;;  %v735_v44 = vmul.f32 50.0, %v1890_v13 }
 0x16a   :  { %1454 = vpow2.f32 %v653_v37  ;;  %v771_v43 = vmul.f32 1.442695, %v744_v17  ;;  %v657_v13 = vmul.f32 1.442695, %v631_v24  ;;  %v626_v49 = vmul.f32 -2.0, %v1905_v27 }
 0x16b   :  { %1456 = vpow2.f32 %v749_v48  ;;  %v753_v57 = vmul.f32 1.442695, %v735_v44  ;;  %v743_v62 = vmul.f32 50.0, %v1892_v14  ;;  %v738_v17 = vmul.f32 50.0, %v1905_v27 }
 0x16c   :  { %v1919_v34 = vpop.f32.mrb[6].mxu0  ;;  %v1936_v40 = vpop.f32.mrb[6].mxu1  ;;  %1458 = vpow2.f32 %v643_v51  ;;  %v647_v1 = vmul.f32 1.442695, %v626_v49 }
 0x16d   :  { %v1938_v41 = vpop.f32.mrb[7].mxu0  ;;  %v1956_v45 = vpop.f32.mrb[7].mxu1  ;;  %1460 = vpow2.f32 %v765_v0  ;;  %v748_v20 = vmul.f32 50.0, %v1936_v40  ;;  %v769_v16 = vmul.f32 1.442695, %v743_v62  ;;  %v628_v37 = vmul.f32 -2.0, %v1919_v34 }
 0x16e   :  { %1462 = vpow2.f32 %v659_v3  ;;  %v2170_v0 = vpop.permute.xlu1 %444  ;;  %v625_v3 = vmul.f32 -2.0, %v1914_v29  ;;  %v759_v26 = vmul.f32 1.442695, %v738_v17  ;;  %v634_v62 = vmul.f32 -2.0, %v1907_v28 }
 0x16f   :  { %v1445_v53 = vpop.eup %1444  ;;  %1464 = vpow2.f32 %v755_v18  ;;  %v779_v46 = vmul.f32 1.442695, %v748_v20  ;;  %v633_v20 = vmul.f32 -2.0, %v1916_v30  ;;  %v635_v17 = vmul.f32 -2.0, %v1956_v45 }
 0x170   :  { %v1447_v55 = vpop.eup %1446  ;;  %v670_v10 = vsel %vm574_vm10, %v1445_v53, 0.0  ;;  %vm452_vm10 = vcmp.eq.s32.totalorder %v1874_v58, %v1921_v35  ;;  %1466 = vpow2.f32 %v641_v12  ;;  %v645_v18 = vmul.f32 1.442695, %v625_v3 }
 0x171   :  { %v1449_v7 = vpop.eup %1448  ;;  %v782_v9 = vsel %vm590_vm9, %v1447_v55, 0.0  ;;  %850 = vadd.xlane.f32.xlu1 %v670_v10  ;;  %vm582_vm9 = vmand %vm2033_vm1, %vm2668_vm5  ;;  %v474_v55 = vadd.s32 56, %v1882_v5  ;;  %1468 = vpow2.f32 %v771_v43 }
 0x172   :  { %v1451_v11 = vpop.eup %1450  ;;  %898 = vadd.xlane.f32.xlu0 %v782_v9  ;;  %v678_v32 = vsel %vm582_vm9, %v1449_v7, 0.0  ;;  %vm2085_vm1 = vmand %vm453_vm14, %vm1961_vm13  ;;  %vm461_vm13 = vcmp.eq.s32.totalorder %v2022_v2, %v1921_v35  ;;  %vm490_vm9 = vcmp.eq.s32.totalorder %v472_v23, %v1894_v15  ;;  %1470 = vpow2.f32 %v779_v46  ;;  %v2185_v7 = vpop.permute.xlu0 %429 }
 0x173   :  { %v1453_v25 = vpop.eup %1452  ;;  %v790_v31 = vsel %vm2057_vm15, %v1451_v11, 0.0  ;;  %vm2106_vm15 = vmand %vm2044_vm2, %vm2668_vm5  ;;  %1472 = vpow2.f32 %v657_v13  ;;  %v479_v13 = vadd.s32 96, %v1882_v5  ;;  %v663_v11 = vmul.f32 1.442695, %v634_v62 }
 0x174   :  { %v1455_v33 = vpop.eup %1454  ;;  %vm573_vm2 = vmand %vm2072_vm4, %vm2668_vm5  ;;  %vm489_vm4 = vcmp.eq.s32.totalorder %v471_v38, %v1894_v15  ;;  %1474 = vpow2.f32 %v753_v57 }
 0x175   :  { %866 = vadd.xlane.f32.xlu1 %v678_v32  ;;  %v1457_v50 = vpop.eup %1456  ;;  %vm2129_vm14 = vmand %vm452_vm10, %vm1995_vm3  ;;  %v677_v52 = vsel %vm2106_vm15, %v1455_v33, 0.0  ;;  %v669_v53 = vsel %vm573_vm2, %v1453_v25, 0.0  ;;  %vm492_vm2 = vcmp.eq.s32.totalorder %v474_v55, %v1894_v15  ;;  %1476 = vpow2.f32 %v647_v1 }
 0x176   :  { %914 = vadd.xlane.f32.xlu0 %v790_v31  ;;  %v1459_v54 = vpop.eup %1458  ;;  %vm2149_vm3 = vmand %vm461_vm13, %vm2011_vm6  ;;  %1478 = vpow2.f32 %v769_v16  ;;  %v737_v31 = vmul.f32 50.0, %v1914_v29  ;;  %v661_v33 = vmul.f32 1.442695, %v633_v20  ;;  %v740_v1 = vmul.f32 50.0, %v1919_v34 }
 0x177   :  { %vm2156_vm0 = vmxor %vm490_vm9, %vm2670_vm7  ;;  %v1461_v14 = vpop.eup %1460  ;;  %vm2722_vm9 = vcmp.eq.s32.totalorder %v2006_v61, %v1921_v35  ;;  %1480 = vpow2.f32 %v645_v18  ;;  %v739_v61 = vmul.f32 50.0, %v1938_v41  ;;  %v665_v25 = vmul.f32 1.442695, %v635_v17 }
 0x178   :  { %vm2166_vm6 = vmand %vm2085_vm1, %vm2668_vm5  ;;  %v1463_v10 = vpop.eup %1462  ;;  %1482 = vpow2.f32 %v759_v26  ;;  %v757_v49 = vmul.f32 1.442695, %v737_v31  ;;  %v763_v16 = vmul.f32 1.442695, %v740_v1 }
 0x179   :  { %864 = vadd.xlane.f32.xlu1 %v677_v52  ;;  %vm589_vm15 = vmand %vm2137_vm8, %vm2668_vm5  ;;  %v672_v9 = vsel %vm2166_vm6, %v1459_v54, 0.0  ;;  %vm2669_vm6 = vcmp.eq.s32.totalorder %v2185_v7, %v1921_v35  ;;  %v1465_v27 = vpop.eup %1464  ;;  %1484 = vpow2.f32 %v661_v33  ;;  %v651_v52 = vmul.f32 1.442695, %v628_v37 }
 0x17a   :  { %848 = vadd.xlane.f32.xlu0 %v669_v53  ;;  %vm2181_vm1 = vmxor %vm2722_vm9, %vm2670_vm7  ;;  %v781_v8 = vsel %vm589_vm15, %v1457_v50, 0.0  ;;  %v1467_v12 = vpop.eup %1466  ;;  %v745_v50 = vmul.f32 50.0, %v1916_v30  ;;  %v627_v30 = vmul.f32 -2.0, %v1938_v41  ;;  %1486 = vpow2.f32 %v757_v49 }
 0x17b   :  { %vm2193_vm8 = vmxor %vm489_vm4, %vm2670_vm7  ;;  %v1469_v32 = vpop.eup %1468  ;;  %1488 = vpow2.f32 %v651_v52  ;;  %v761_v24 = vmul.f32 1.442695, %v739_v61 }
 0x17c   :  { %vm2201_vm9 = vmxor %vm461_vm13, %vm2670_vm7  ;;  %v2263_v38 = vpop.eup %1470  ;;  %v773_v63 = vmul.f32 1.442695, %v745_v50  ;;  %v649_v3 = vmul.f32 1.442695, %v627_v30 }
 0x17d   :  { %854 = vadd.xlane.f32.xlu1 %v672_v9  ;;  %vm584_vm13 = vmand %vm2149_vm3, %vm2668_vm5  ;;  %v1473_v44 = vpop.eup %1472 }
 0x17e   :  { %896 = vadd.xlane.f32.xlu0 %v781_v8  ;;  %vm2218_vm4 = vmxor %vm452_vm10, %vm2670_vm7  ;;  %v680_v23 = vsel %vm584_vm13, %v1463_v10, 0.0  ;;  %v1475_v53 = vpop.eup %1474  ;;  %1490 = vpow2.f32 %v773_v63 }
 0x17f   :  { %vm597_vm15 = vmand %vm2181_vm1, %vm2668_vm5  ;;  %vm2735_vm1 = vcmp.eq.s32.totalorder %v2170_v0, %v1921_v35  ;;  %v1477_v56 = vpop.eup %1476  ;;  %1492 = vpow2.f32 %v649_v3 }
 0x180   :  { %vm2232_vm3 = vmand %vm2669_vm6, %vm2095_vm11  ;;  %v789_v21 = vsel %vm597_vm15, %v1461_v14, 0.0  ;;  %vm455_vm11 = vcmp.eq.s32.totalorder %v1884_v6, %v1921_v35  ;;  %v1479_v14 = vpop.eup %1478  ;;  %1494 = vpow2.f32 %v663_v11 }
 0x181   :  { %vm2239_vm10 = vmxor %vm492_vm2, %vm2670_vm7  ;;  %870 = vadd.xlane.f32.xlu1 %v680_v23  ;;  %vm2738_vm2 = vcmp.lt.s32.totalorder %v1894_v15, 8  ;;  %v1481_v34 = vpop.eup %1480  ;;  %v482_v23 = vadd.s32 120, %v1882_v5  ;;  %1496 = vpow2.f32 %v763_v16 }
 0x182   :  { %vm2247_vm5 = vmxor %vm2735_vm1, %vm2670_vm7  ;;  %912 = vadd.xlane.f32.xlu0 %v789_v21  ;;  %v1483_v2 = vpop.eup %1482  ;;  %1498 = vpow2.f32 %v761_v24  ;;  %v2521_v21 = vadd.s32 4294967232, %v1894_v15 }
 0x183   :  { %vm592_vm15 = vmand %vm2114_vm12, %vm2738_vm2  ;;  %1500 = vpow2.f32 %v665_v25  ;;  %v2530_v25 = vadd.s32 4294967280, %v1894_v15 }
 0x184   :  { %vm2739_vm13 = vmmov %vm2738_vm2  ;;  %v784_v42 = vsel %vm592_vm15, %v1465_v27, 0.0  ;;  %v1485_v27 = vpop.eup %1484 }
 0x185   :  { %vm575_vm1 = vmand %vm2129_vm14, %vm2739_vm13  ;;  %vm2672_vm14 = vcmp.eq.s32.totalorder %v1899_v19, %v1921_v35  ;;  %v1487_v26 = vpop.eup %1486  ;;  %v1134_v50 = vsub.s32 %v2530_v25, %v1882_v5 }
 0x186   :  { %v671_v43 = vsel %vm575_vm1, %v1467_v12, 0.0  ;;  %vm2740_vm6 = vmmov %vm2738_vm2  ;;  %902 = vadd.xlane.f32.xlu0 %v784_v42  ;;  %vm2754_vm1 = vcmp.eq.s32.totalorder %v2185_v7, %v1921_v35  ;;  %v436_v7 = vpop.permute.xlu0 %435  ;;  %v746_v12 = vmul.f32 50.0, %v1907_v28  ;;  %v1489_v33 = vpop.eup %1488 }
 0x187   :  { %vm2269_vm7 = vmand %vm2247_vm5, %vm2740_vm6  ;;  %852 = vadd.xlane.f32.xlu1 %v671_v43  ;;  %vm2748_vm6 = vmmov 1   ;;  %v747_v43 = vmul.f32 50.0, %v1956_v45 }
 0x188   :  { %vm2278_vm12 = vmand %vm455_vm11, %vm2156_vm0  ;;  %v796_v48 = vsel %vm2269_vm7, %v2263_v38, 0.0  ;;  %v775_v37 = vmul.f32 1.442695, %v746_v12  ;;  %v2515_v38 = vadd.s32 4294967288, %v1894_v15  ;;  %v2524_v12 = vadd.s32 4294967272, %v1894_v15 }
 0x189   :  { %vm2745_vm5 = vmmov %vm2738_vm2 }
 0x18a   :  { %vm2294_vm0 = vmand %vm2201_vm9, %vm2745_vm5  ;;  %v442_v60 = vpop.permute.xlu0 %441  ;;  %1502 = vpow2.f32 %v775_v37  ;;  %v1122_v37 = vsub.s32 %v1894_v15, %v1882_v5 }
 0x18b   :  { %vm2302_vm2 = vmxor %vm455_vm11, %vm2748_vm6  ;;  %v792_v54 = vsel %vm2294_vm0, %v1469_v32, 0.0  ;;  %vm457_vm11 = vcmp.eq.s32.totalorder %v1901_v22, %v1921_v35  ;;  %v481_v22 = vadd.s32 112, %v1882_v5 }
 0x18c   :  { %vm2751_vm15 = vmmov %vm2745_vm5  ;;  %918 = vadd.xlane.f32.xlu0 %v792_v54  ;;  %vm497_vm5 = vcmp.eq.s32.totalorder %v479_v13, %v1894_v15 }
 0x18d   :  { %vm583_vm9 = vmand %vm2232_vm3, %vm2751_vm15  ;;  %vm491_vm3 = vcmp.eq.s32.totalorder %v473_v47, %v1894_v15 }
 0x18e   :  { %vm2316_vm13 = vmand %vm2672_vm14, %vm2193_vm8  ;;  %v679_v55 = vsel %vm583_vm9, %v1473_v44, 0.0  ;;  %v1491_v44 = vpop.eup %1490 }
 0x18f   :  { %vm2330_vm8 = vmxor %vm2754_vm1, %vm2748_vm6  ;;  %868 = vadd.xlane.f32.xlu1 %v679_v55  ;;  %v1493_v49 = vpop.eup %1492 }
 0x190   :  { %vm2757_vm0 = vmmov %vm2751_vm15  ;;  %v1495_v51 = vpop.eup %1494 }
 0x191   :  { %vm591_vm15 = vmand %vm2218_vm4, %vm2757_vm0 }
 0x192   :  { %vm2758_vm9 = vmmov %vm2757_vm0  ;;  %v783_v8 = vsel %vm591_vm15, %v1475_v53, 0.0  ;;  %vm498_vm0 = vcmp.eq.s32.totalorder %v480_v59, %v1894_v15  ;;  %v1497_v53 = vpop.eup %1496 }
 0x193   :  { %vm578_vm1 = vmand %vm2278_vm12, %vm2758_vm9  ;;  %900 = vadd.xlane.f32.xlu0 %v783_v8  ;;  %v1499_v6 = vpop.eup %1498 }
 0x194   :  { %vm2350_vm14 = vmand %vm457_vm11, %vm2239_vm10  ;;  %v674_v9 = vsel %vm578_vm1, %v1477_v56, 0.0  ;;  %vm462_vm10 = vcmp.eq.s32.totalorder %v436_v7, %v1921_v35  ;;  %v1501_v56 = vpop.eup %1500 }
 0x195   :  { %vm2357_vm4 = vmxor %vm491_vm3, %vm2748_vm6  ;;  %858 = vadd.xlane.f32.xlu1 %v674_v9  ;;  %v1503_v59 = vpop.eup %1502 }
 0x196   :  { %vm533_vm12 = vmxor %vm497_vm5, %vm2748_vm6 }
 0x197   :  { %vm2763_vm15 = vmmov %vm2758_vm9 }
 0x198   :  { %vm599_vm3 = vmand %vm2330_vm8, %vm2763_vm15  ;;  %vm2767_vm8 = vcmp.eq.s32.totalorder %v1899_v19, %v1921_v35  ;;  %v636_v19 = vmul.f32 -2.0, %v1936_v40 }
 0x199   :  { %vm2764_vm5 = vmmov %vm2758_vm9  ;;  %v791_v41 = vsel %vm599_vm3, %v1479_v14, 0.0 }
 0x19a   :  { %vm577_vm9 = vmand %vm2316_vm13, %vm2764_vm5  ;;  %916 = vadd.xlane.f32.xlu0 %v791_v41  ;;  %v667_v42 = vmul.f32 1.442695, %v636_v19  ;;  %v2527_v19 = vadd.s32 4294967208, %v1894_v15 }
 0x19b   :  { %vm2378_vm1 = vmand %vm462_vm10, %vm533_vm12  ;;  %v673_v20 = vsel %vm577_vm9, %v1481_v34, 0.0 }
 0x19c   :  { %vm2386_vm15 = vmxor %vm2767_vm8, %vm2748_vm6  ;;  %856 = vadd.xlane.f32.xlu1 %v673_v20  ;;  %1504 = vpow2.f32 %v667_v42  ;;  %v1176_v42 = vsub.s32 %v2521_v21, %v1882_v5  ;;  %v1197_v45 = vsub.s32 %v2527_v19, %v1882_v5 }
 0x19d   :  { %vm2393_vm13 = vmxor %vm498_vm0, %vm2748_vm6 }
 0x19e   :  { %vm2772_vm12 = vmmov %vm2764_vm5 }
 0x19f   :  { %vm594_vm3 = vmand %vm2302_vm2, %vm2772_vm12  ;;  %vm456_vm2 = vcmp.eq.s32.totalorder %v1923_v36, %v1921_v35  ;;  %v777_v36 = vmul.f32 1.442695, %v747_v43  ;;  %v2541_v43 = vadd.s32 4294967216, %v1894_v15 }
 0x1a0   :  { %vm2773_vm0 = vmmov %vm2764_vm5  ;;  %v786_v31 = vsel %vm594_vm3, %v1483_v2, 0.0 }
 0x1a1   :  { %vm585_vm5 = vmand %vm2378_vm1, %vm2773_vm0  ;;  %906 = vadd.xlane.f32.xlu0 %v786_v31  ;;  %1506 = vpow2.f32 %v777_v36 }
 0x1a2   :  { %vm2412_vm9 = vmxor %vm457_vm11, %vm2748_vm6  ;;  %v681_v32 = vsel %vm585_vm5, %v1485_v27, 0.0  ;;  %vm500_vm11 = vcmp.eq.s32.totalorder %v482_v23, %v1894_v15  ;;  %vm499_vm5 = vcmp.eq.s32.totalorder %v481_v22, %v1894_v15 }
 0x1a3   :  { %vm2421_vm8 = vmxor %vm462_vm10, %vm2748_vm6  ;;  %872 = vadd.xlane.f32.xlu1 %v681_v32 }
 0x1a4   :  { %vm2778_vm1 = vmmov %vm2773_vm0 }
 0x1a5   :  { %vm593_vm12 = vmand %vm2386_vm15, %vm2778_vm1 }
 0x1a6   :  { %vm2779_vm10 = vmmov %vm2773_vm0  ;;  %v785_v47 = vsel %vm593_vm12, %v1487_v26, 0.0  ;;  %v1505_v62 = vpop.eup %1504  ;;  %v1127_v26 = vsub.s32 %v2515_v38, %v1882_v5 }
 0x1a7   :  { %vm580_vm3 = vmand %vm2350_vm14, %vm2779_vm10  ;;  %vm463_vm14 = vcmp.eq.s32.totalorder %v2090_v39, %v1921_v35  ;;  %904 = vadd.xlane.f32.xlu0 %v785_v47  ;;  %v1141_v47 = vsub.s32 %v2524_v12, %v1882_v5 }
 0x1a8   :  { %vm2441_vm0 = vmand %vm456_vm2, %vm2357_vm4  ;;  %v676_v13 = vsel %vm580_vm3, %v1489_v33, 0.0 }
 0x1a9   :  { %vm2449_vm15 = vmxor %vm456_vm2, %vm2748_vm6  ;;  %862 = vadd.xlane.f32.xlu1 %v676_v13  ;;  %v2546_v13 = vadd.s32 4294967256, %v1894_v15 }
 0x1aa   :  { %vm2458_vm4 = vmxor %vm500_vm11, %vm2748_vm6 }
 0x1ab   :  { %vm2786_vm2 = vmmov %vm2778_vm1  ;;  %v1507_v3 = vpop.eup %1506 }
 0x1ac   :  { %vm601_vm1 = vmand %vm2421_vm8, %vm2786_vm2  ;;  %vm464_vm8 = vcmp.eq.s32.totalorder %v442_v60, %v1921_v35 }
 0x1ad   :  { %vm2787_vm12 = vmmov %vm2786_vm2  ;;  %v793_v52 = vsel %vm601_vm1, %v1491_v44, 0.0 }
 0x1ae   :  { %vm579_vm11 = vmand %vm2441_vm0, %vm2787_vm12  ;;  %920 = vadd.xlane.f32.xlu0 %v793_v52 }
 0x1af   :  { %vm550_vm10 = vmand %vm463_vm14, %vm2393_vm13  ;;  %v675_v30 = vsel %vm579_vm11, %v1493_v49, 0.0 }
 0x1b0   :  { %vm535_vm3 = vmxor %vm499_vm5, %vm2748_vm6  ;;  %860 = vadd.xlane.f32.xlu1 %v675_v30 }
 0x1b1   :  { %vm596_vm0 = vmand %vm2412_vm9, %vm2786_vm2 }
 0x1b2   :  { %vm2788_vm12 = vmmov %vm2786_vm2  ;;  %v788_v54 = vsel %vm596_vm0, %v1497_v53, 0.0  ;;  %v2553_v53 = vadd.s32 4294967264, %v1894_v15 }
 0x1b3   :  { %vm586_vm7 = vmand %vm550_vm10, %vm2788_vm12  ;;  %910 = vadd.xlane.f32.xlu0 %v788_v54 }
 0x1b4   :  { %vm551_vm13 = vmand %vm464_vm8, %vm535_vm3  ;;  %v682_v55 = vsel %vm586_vm7, %v1495_v51, 0.0  ;;  %vm2791_vm7 = vcmp.eq.s32.totalorder %v2170_v0, %v1921_v35 }
 0x1b5   :  { %vm566_vm5 = vmxor %vm463_vm14, %vm2748_vm6  ;;  %874 = vadd.xlane.f32.xlu1 %v682_v55  ;;  %v1190_v55 = vsub.s32 %v2541_v43, %v1882_v5 }
 0x1b6   :  { %vm2789_vm9 = vmmov %vm2786_vm2 }
 0x1b7   :  { %vm595_vm1 = vmand %vm2449_vm15, %vm2789_vm9 }
 0x1b8   :  { %vm2790_vm11 = vmmov %vm2786_vm2  ;;  %v787_v57 = vsel %vm595_vm1, %v1499_v6, 0.0  ;;  %vm1150_vm1 = vcmask 326912  }
 0x1b9   :  { %vm587_vm10 = vmand %vm551_vm13, %vm2790_vm11  ;;  %908 = vadd.xlane.f32.xlu0 %v787_v57  ;;  %vm1157_vm11 = vcmask 392512  }
 0x1ba   :  { %vm552_vm3 = vmand %vm2791_vm7, %vm2458_vm4  ;;  %v683_v39 = vsel %vm587_vm10, %v1501_v56, 0.0  ;;  %v2558_v56 = vadd.s32 4294967200, %v1894_v15  ;;  %vm1164_vm10 = vcmask 458112   ;;  %vm1171_vm7 = vcmask 523712  }
 0x1bb   :  { %876 = vadd.xlane.f32.xlu1 %v683_v39  ;;  %vm2792_vm14 = vmmov %vm2786_vm2 }
 0x1bc   :  { %vm602_vm2 = vmand %vm566_vm5, %vm2792_vm14  ;;  %vm1143_vm5 = vcmask 261312   ;;  %vm1185_vm14 = vcmask 654912  }
 0x1bd   :  { %vm2793_vm15 = vmmov %vm2789_vm9  ;;  %v794_v63 = vsel %vm602_vm2, %v1503_v59, 0.0  ;;  %vm1192_vm2 = vcmask 720512  }
 0x1be   :  { %vm588_vm0 = vmand %vm552_vm3, %vm2793_vm15  ;;  %922 = vadd.xlane.f32.xlu0 %v794_v63  ;;  %vm1178_vm3 = vcmask 589312   ;;  %vm1199_vm15 = vcmask 786112  }
 0x1bf   :  { %vm567_vm12 = vmxor %vm464_vm8, %vm2748_vm6  ;;  %v684_v1 = vsel %vm588_vm0, %v1505_v62, 0.0  ;;  %v1155_v62 = vsub.s32 %v2546_v13, %v1882_v5  ;;  %vm1129_vm6 = vcmask 130112   ;;  %vm1136_vm8 = vcmask 195712  }
 0x1c0   :  { %878 = vadd.xlane.f32.xlu1 %v684_v1  ;;  %vm2794_vm4 = vmmov %vm2789_vm9  ;;  %vm1206_vm0 = vcmask 851712  }
 0x1c1   :  { %vm603_vm13 = vmand %vm567_vm12, %vm2794_vm4  ;;  %vm1213_vm12 = vcmask 917312   ;;  %vm1220_vm4 = vcmask 982912  }
 0x1c2   :  { %v795_v0 = vsel %vm603_vm13, %v1507_v3, 0.0  ;;  %vm1227_vm13 = vcmask 1048512  }
 0x1c3   :  { %924 = vadd.xlane.f32.xlu0 %v795_v0  ;;  %v2563_v0 = vadd.s32 4294967240, %v1894_v15 }
 0x1c7   :  { %926 = vadd.xlane.f32.xlu0 %v796_v48  ;;  %v2518_v48 = vadd.s32 4294967224, %v1894_v15 }
 0x1c9   :  { %v1183_v31 = vsub.s32 %v2518_v48, %v1882_v5 }
 0x1fe   :  { %v851_v4 = vpop.xlane.xlu1 %850 }
 0x1ff   :  { %v899_v14 = vpop.xlane.xlu0 %898  ;;  %v929_v17 = vmul.f32 2.7182817, %v851_v4 }
 0x200   :  { %v1009_v11 = vmul.f32 1.3887944e-11, %v899_v14 }
 0x201   :  { %v945_v20 = vadd.f32 1.0, %v929_v17 }
 0x202   :  { %v867_v35 = vpop.xlane.xlu1 %866  ;;  %v1025_v2 = vadd.f32 1.0, %v1009_v11 }
 0x203   :  { %v915_v7 = vpop.xlane.xlu0 %914  ;;  %v937_v24 = vmul.f32 2.7182817, %v867_v35 }
 0x204   :  { %1508 = vlog2.f32 %v1025_v2  ;;  %v1017_v29 = vmul.f32 1.3887944e-11, %v915_v7 }
 0x205   :  { %1510 = vlog2.f32 %v945_v20  ;;  %v953_v49 = vadd.f32 1.0, %v937_v24  ;;  %v2572_v24 = vadd.s32 4294967248, %v1894_v15 }
 0x206   :  { %v865_v8 = vpop.xlane.xlu1 %864  ;;  %v1033_v28 = vadd.f32 1.0, %v1017_v29 }
 0x207   :  { %v849_v9 = vpop.xlane.xlu0 %848  ;;  %v936_v22 = vmul.f32 2.7182817, %v865_v8  ;;  %v1148_v8 = vsub.s32 %v2553_v53, %v1882_v5 }
 0x208   :  { %v928_v32 = vmul.f32 2.7182817, %v849_v9  ;;  %1512 = vlog2.f32 %v1033_v28 }
 0x209   :  { %v952_v6 = vadd.f32 1.0, %v936_v22 }
 0x20a   :  { %v855_v10 = vpop.xlane.xlu1 %854  ;;  %v944_v36 = vadd.f32 1.0, %v928_v32 }
 0x20b   :  { %v897_v34 = vpop.xlane.xlu0 %896  ;;  %v931_v46 = vmul.f32 2.7182817, %v855_v10  ;;  %v1204_v10 = vsub.s32 %v2558_v56, %v1882_v5 }
 0x20c   :  { %v1008_v23 = vmul.f32 1.3887944e-11, %v897_v34 }
 0x20d   :  { %v947_v57 = vadd.f32 1.0, %v931_v46 }
 0x20e   :  { %v871_v16 = vpop.xlane.xlu1 %870  ;;  %v1024_v44 = vadd.f32 1.0, %v1008_v23  ;;  %v1509_v59 = vpop.eup %1508 }
 0x20f   :  { %v913_v61 = vpop.xlane.xlu0 %912  ;;  %v1511_v63 = vpop.eup %1510  ;;  %v939_v1 = vmul.f32 2.7182817, %v871_v16  ;;  %v1043_v9 = vmul.f32 0.6931472, %v1509_v59 }
 0x210   :  { %1514 = vlog2.f32 %v1024_v44  ;;  %v1016_v39 = vmul.f32 1.3887944e-11, %v913_v61  ;;  %v963_v11 = vmul.f32 0.6931472, %v1511_v63 }
 0x211   :  { %1516 = vlog2.f32 %v953_v49  ;;  %v955_v17 = vadd.f32 1.0, %v939_v1  ;;  %v1073_v28 = vmul.f32 0.02, %v1043_v9 }
 0x212   :  { %1518 = vlog2.f32 %v944_v36  ;;  %v1032_v61 = vadd.f32 1.0, %v1016_v39  ;;  %v1513_v22 = vpop.eup %1512 }
 0x213   :  { %v903_v18 = vpop.xlane.xlu0 %902  ;;  %1520 = vlog2.f32 %v952_v6 }
 0x214   :  { %v853_v41 = vpop.xlane.xlu1 %852  ;;  %v1011_v51 = vmul.f32 1.3887944e-11, %v903_v18  ;;  %1522 = vlog2.f32 %v947_v57  ;;  %v1169_v18 = vsub.s32 %v2563_v0, %v1882_v5  ;;  %v1059_v57 = vmul.f32 0.6931472, %v1513_v22 }
 0x215   :  { %v930_v54 = vmul.f32 2.7182817, %v853_v41 }
 0x216   :  { %v1027_v14 = vadd.f32 1.0, %v1011_v51  ;;  %v1081_v22 = vmul.f32 0.02, %v1059_v57 }
 0x217   :  { %v946_v34 = vadd.f32 1.0, %v930_v54  ;;  %v1162_v54 = vsub.s32 %v2572_v24, %v1882_v5 }
 0x219   :  { %v919_v27 = vpop.xlane.xlu0 %918 }
 0x21a   :  { %v1019_v16 = vmul.f32 1.3887944e-11, %v919_v27  ;;  %v993_v27 = vmul.f32 0.5, %v963_v11  ;;  %v1515_v36 = vpop.eup %1514 }
 0x21b   :  { %v1517_v59 = vpop.eup %1516 }
 0x21c   :  { %v869_v58 = vpop.xlane.xlu1 %868  ;;  %v1519_v63 = vpop.eup %1518  ;;  %v1089_v1 = vadd.f32 %v1073_v28, %v993_v27 }
 0x21d   :  { %v938_v2 = vmul.f32 2.7182817, %v869_v58  ;;  %v1035_v58 = vadd.f32 1.0, %v1019_v16 }
 0x21f   :  { %v954_v46 = vadd.f32 1.0, %v938_v2 }
 0x220   :  { %v901_v33 = vpop.xlane.xlu0 %900 }
 0x221   :  { %v1010_v60 = vmul.f32 1.3887944e-11, %v901_v33 }
 0x222   :  { %v859_v40 = vpop.xlane.xlu1 %858 }
 0x223   :  { %v1026_v3 = vadd.f32 1.0, %v1010_v60  ;;  %v933_v32 = vmul.f32 2.7182817, %v859_v40  ;;  %v2577_v40 = vadd.s32 4294967192, %v1894_v15 }
 0x225   :  { %1524 = vlog2.f32 %v1026_v3  ;;  %v949_v39 = vadd.f32 1.0, %v933_v32  ;;  %v1211_v28 = vsub.s32 %v2577_v40, %v1882_v5 }
 0x226   :  { %1526 = vlog2.f32 %v1027_v14 }
 0x227   :  { %v917_v52 = vpop.xlane.xlu0 %916  ;;  %1528 = vlog2.f32 %v946_v34  ;;  %v2580_v34 = vadd.s32 4294967184, %v1894_v15 }
 0x228   :  { %1530 = vlog2.f32 %v1032_v61  ;;  %v1018_v44 = vmul.f32 1.3887944e-11, %v917_v52  ;;  %v979_v61 = vmul.f32 0.6931472, %v1517_v59 }
 0x229   :  { %v857_v30 = vpop.xlane.xlu1 %856  ;;  %1532 = vlog2.f32 %v955_v17  ;;  %v1218_v48 = vsub.s32 %v2580_v34, %v1882_v5 }
 0x22a   :  { %v932_v4 = vmul.f32 2.7182817, %v857_v30  ;;  %v1034_v3 = vadd.f32 1.0, %v1018_v44 }
 0x22c   :  { %v948_v41 = vadd.f32 1.0, %v932_v4  ;;  %v1521_v4 = vpop.eup %1520 }
 0x22d   :  { %v1523_v11 = vpop.eup %1522 }
 0x22e   :  { %v907_v7 = vpop.xlane.xlu0 %906  ;;  %1534 = vlog2.f32 %v948_v41 }
 0x22f   :  { %v1013_v20 = vmul.f32 1.3887944e-11, %v907_v7  ;;  %v1041_v7 = vmul.f32 0.6931472, %v1515_v36 }
 0x230   :  { %v873_v35 = vpop.xlane.xlu1 %872 }
 0x231   :  { %v1029_v51 = vadd.f32 1.0, %v1013_v20  ;;  %v940_v16 = vmul.f32 2.7182817, %v873_v35  ;;  %v1525_v20 = vpop.eup %1524 }
 0x232   :  { %v1527_v32 = vpop.eup %1526  ;;  %v1045_v36 = vmul.f32 0.6931472, %v1525_v20 }
 0x233   :  { %v1529_v35 = vpop.eup %1528 }
 0x234   :  { %v905_v29 = vpop.xlane.xlu0 %904 }
 0x235   :  { %v1012_v33 = vmul.f32 1.3887944e-11, %v905_v29  ;;  %v961_v29 = vmul.f32 0.6931472, %v1519_v63  ;;  %v965_v63 = vmul.f32 0.6931472, %v1529_v35 }
 0x236   :  { %v863_v23 = vpop.xlane.xlu1 %862 }
 0x237   :  { %v1028_v49 = vadd.f32 1.0, %v1012_v33  ;;  %v935_v60 = vmul.f32 2.7182817, %v863_v23  ;;  %v2587_v33 = vrot.slane %v1089_v1, %v1127_v26  ;;  %v992_v38 = vmul.f32 0.5, %v961_v29 }
 0x239   :  { %1536 = vlog2.f32 %v1028_v49  ;;  %v951_v9 = vadd.f32 1.0, %v935_v60  ;;  %v1531_v49 = vpop.eup %1530  ;;  %v1001_v60 = vmul.f32 0.5, %v979_v61 }
 0x23a   :  { %1538 = vlog2.f32 %v1035_v58  ;;  %v1072_v58 = vmul.f32 0.02, %v1041_v7  ;;  %v1533_v59 = vpop.eup %1532  ;;  %v967_v7 = vmul.f32 0.6931472, %v1523_v11  ;;  %v994_v11 = vmul.f32 0.5, %v965_v63 }
 0x23b   :  { %v921_v30 = vpop.xlane.xlu0 %920  ;;  %1540 = vlog2.f32 %v954_v46  ;;  %v1535_v57 = vpop.eup %1534 }
 0x23c   :  { %v1020_v14 = vmul.f32 1.3887944e-11, %v921_v30  ;;  %1542 = vlog2.f32 %v1029_v51  ;;  %v956_v51 = vadd.f32 1.0, %v940_v16 }
 0x23d   :  { %v861_v6 = vpop.xlane.xlu1 %860  ;;  %1544 = vlog2.f32 %v949_v39  ;;  %v977_v39 = vmul.f32 0.6931472, %v1521_v4 }
 0x23e   :  { %v934_v52 = vmul.f32 2.7182817, %v861_v6  ;;  %1546 = vlog2.f32 %v1034_v3  ;;  %v1036_v27 = vadd.f32 1.0, %v1020_v14  ;;  %v1088_v14 = vadd.f32 %v1072_v58, %v992_v38 }
 0x23f   :  { %1548 = vlog2.f32 %v951_v9 }
 0x240   :  { %v950_v17 = vadd.f32 1.0, %v934_v52  ;;  %v911_v2 = vpop.xlane.xlu0 %910  ;;  %v1047_v52 = vmul.f32 0.6931472, %v1527_v32 }
 0x241   :  { %v1015_v23 = vmul.f32 1.3887944e-11, %v911_v2 }
 0x242   :  { %v875_v41 = vpop.xlane.xlu1 %874  ;;  %1550 = vlog2.f32 %v950_v17  ;;  %v1074_v17 = vmul.f32 0.02, %v1045_v36  ;;  %v1075_v58 = vmul.f32 0.02, %v1047_v52  ;;  %v2591_v36 = vmul.f32 0.6931472, %v1533_v59 }
 0x243   :  { %v1031_v44 = vadd.f32 1.0, %v1015_v23  ;;  %v941_v46 = vmul.f32 2.7182817, %v875_v41  ;;  %v1537_v3 = vpop.eup %1536  ;;  %v1057_v23 = vmul.f32 0.6931472, %v1531_v49 }
 0x244   :  { %v1539_v16 = vpop.eup %1538  ;;  %v1049_v2 = vmul.f32 0.6931472, %v1537_v3 }
 0x245   :  { %1552 = vlog2.f32 %v1031_v44  ;;  %v957_v9 = vadd.f32 1.0, %v941_v46  ;;  %v1541_v29 = vpop.eup %1540  ;;  %v2589_v44 = vadd.f32 %v1081_v22, %v1001_v60  ;;  %v969_v46 = vmul.f32 0.6931472, %v1535_v57 }
 0x246   :  { %v909_v30 = vpop.xlane.xlu0 %908  ;;  %1554 = vlog2.f32 %v1036_v27  ;;  %v1543_v35 = vpop.eup %1542  ;;  %v1076_v49 = vmul.f32 0.02, %v1049_v2  ;;  %v1123_v22 = vrot.slane %v1088_v14, %v1122_v37  ;;  %v1080_v52 = vmul.f32 0.02, %v1057_v23 }
 0x247   :  { %v1014_v26 = vmul.f32 1.3887944e-11, %v909_v30  ;;  %1556 = vlog2.f32 %v956_v51  ;;  %v1545_v30 = vpop.eup %1544  ;;  %v1051_v60 = vmul.f32 0.6931472, %v1543_v35  ;;  %v981_v25 = vmul.f32 0.6931472, %v1541_v29 }
 0x248   :  { %v877_v6 = vpop.xlane.xlu1 %876  ;;  %v1547_v38 = vpop.eup %1546  ;;  %v971_v2 = vmul.f32 0.6931472, %v1545_v30 }
 0x249   :  { %v942_v1 = vmul.f32 2.7182817, %v877_v6  ;;  %v1030_v61 = vadd.f32 1.0, %v1014_v26  ;;  %v995_v6 = vmul.f32 0.5, %v967_v7  ;;  %v1090_v26 = vadd.f32 %v1074_v17, %v994_v11 }
 0x24a   :  { %v1063_v7 = vmul.f32 0.6931472, %v1539_v16  ;;  %v1077_v11 = vmul.f32 0.02, %v1051_v60 }
 0x24b   :  { %v958_v41 = vadd.f32 1.0, %v942_v1  ;;  %v923_v4 = vpop.xlane.xlu0 %922  ;;  %1558 = vlog2.f32 %v1030_v61  ;;  %v1549_v61 = vpop.eup %1548  ;;  %v1091_v63 = vadd.f32 %v1075_v58, %v995_v6  ;;  %v997_v6 = vmul.f32 0.5, %v971_v2 }
 0x24c   :  { %v1021_v32 = vmul.f32 1.3887944e-11, %v923_v4  ;;  %1560 = vlog2.f32 %v957_v9  ;;  %v1551_v59 = vpop.eup %1550  ;;  %v996_v9 = vmul.f32 0.5, %v969_v46  ;;  %v1000_v4 = vmul.f32 0.5, %v977_v39 }
 0x24d   :  { %v879_v20 = vpop.xlane.xlu1 %878  ;;  %1562 = vlog2.f32 %v958_v41  ;;  %v1061_v41 = vmul.f32 0.6931472, %v1547_v38  ;;  %v975_v23 = vmul.f32 0.6931472, %v1549_v61  ;;  %v1130_v39 = vsel %vm1129_vm6, %v2587_v33, %v1123_v22 }
 0x24e   :  { %v943_v27 = vmul.f32 2.7182817, %v879_v20  ;;  %v1037_v51 = vadd.f32 1.0, %v1021_v32  ;;  %v1092_v37 = vadd.f32 %v1076_v49, %v996_v9  ;;  %v1142_v46 = vrot.slane %v1091_v63, %v1141_v47 }
 0x24f   :  { %v1553_v17 = vpop.eup %1552  ;;  %v1083_v49 = vmul.f32 0.02, %v1063_v7  ;;  %v1082_v47 = vmul.f32 0.02, %v1061_v41  ;;  %v1093_v29 = vadd.f32 %v1077_v11, %v997_v6  ;;  %v999_v61 = vmul.f32 0.5, %v975_v23 }
 0x250   :  { %v959_v1 = vadd.f32 1.0, %v943_v27  ;;  %v925_v3 = vpop.xlane.xlu0 %924  ;;  %1564 = vlog2.f32 %v1037_v51  ;;  %v1555_v32 = vpop.eup %1554  ;;  %v1135_v27 = vrot.slane %v1090_v26, %v1134_v50  ;;  %v1055_v14 = vmul.f32 0.6931472, %v1553_v17 }
 0x251   :  { %v1022_v57 = vmul.f32 1.3887944e-11, %v925_v3  ;;  %v1557_v58 = vpop.eup %1556  ;;  %v973_v50 = vmul.f32 0.6931472, %v1551_v59  ;;  %v1065_v51 = vmul.f32 0.6931472, %v1555_v32  ;;  %v1149_v33 = vrot.slane %v1092_v37, %v1148_v8 }
 0x252   :  { %1566 = vlog2.f32 %v959_v1  ;;  %v1079_v38 = vmul.f32 0.02, %v1055_v14  ;;  %v1137_v1 = vsel %vm1136_vm8, %v1135_v27, %v1130_v39  ;;  %v1096_v60 = vadd.f32 %v1080_v52, %v1000_v4 }
 0x253   :  { %v1038_v20 = vadd.f32 1.0, %v1022_v57  ;;  %v985_v57 = vmul.f32 0.6931472, %v1557_v58  ;;  %v998_v59 = vmul.f32 0.5, %v973_v50  ;;  %v1002_v9 = vmul.f32 0.5, %v981_v25 }
 0x254   :  { %v927_v35 = vpop.xlane.xlu0 %926  ;;  %v1144_v17 = vsel %vm1143_vm5, %v1142_v46, %v1137_v1  ;;  %v1084_v53 = vmul.f32 0.02, %v1065_v51  ;;  %v1095_v8 = vadd.f32 %v1079_v38, %v999_v61  ;;  %v1003_v27 = vmul.f32 0.5, %v2591_v36 }
 0x255   :  { %1568 = vlog2.f32 %v1038_v20  ;;  %v1023_v16 = vmul.f32 1.3887944e-11, %v927_v35  ;;  %v1559_v30 = vpop.eup %1558  ;;  %v1151_v2 = vsel %vm1150_vm1, %v1149_v33, %v1144_v17  ;;  %v1098_v37 = vadd.f32 %v1082_v47, %v1002_v9 }
 0x256   :  { %v1053_v3 = vmul.f32 0.6931472, %v1559_v30  ;;  %v1561_v12 = vpop.eup %1560  ;;  %v1156_v52 = vrot.slane %v1093_v29, %v1155_v62  ;;  %v1004_v35 = vmul.f32 0.5, %v985_v57  ;;  %v1177_v36 = vrot.slane %v1096_v60, %v1176_v42 }
 0x257   :  { %v1039_v26 = vadd.f32 1.0, %v1023_v16  ;;  %v1563_v22 = vpop.eup %1562  ;;  %v987_v20 = vmul.f32 0.6931472, %v1561_v12  ;;  %v1222_v16 = vadd.s32 4294967176, %v1894_v15  ;;  %v1099_v39 = vadd.f32 %v1083_v49, %v1003_v27 }
 0x258   :  { %v1078_v63 = vmul.f32 0.02, %v1053_v3  ;;  %v989_v4 = vmul.f32 0.6931472, %v1563_v22  ;;  %v1170_v13 = vrot.slane %v1095_v8, %v1169_v18  ;;  %v1158_v62 = vsel %vm1157_vm11, %v1156_v52, %v1151_v2 }
 0x259   :  { %1570 = vlog2.f32 %v1039_v26  ;;  %v1100_v46 = vadd.f32 %v1084_v53, %v1004_v35  ;;  %v1005_v25 = vmul.f32 0.5, %v987_v20  ;;  %v1184_v15 = vrot.slane %v2589_v44, %v1183_v31 }
 0x25a   :  { %v1565_v7 = vpop.eup %1564  ;;  %v1094_v41 = vadd.f32 %v1078_v63, %v998_v59  ;;  %v1191_v21 = vrot.slane %v1098_v37, %v1190_v55  ;;  %v1006_v0 = vmul.f32 0.5, %v989_v4  ;;  %v1198_v38 = vrot.slane %v1099_v39, %v1197_v45 }
 0x25b   :  { %v1067_v32 = vmul.f32 0.6931472, %v1565_v7  ;;  %v1205_v43 = vrot.slane %v1100_v46, %v1204_v10  ;;  %v1225_v19 = vsub.s32 %v1222_v16, %v1882_v5 }
 0x25c   :  { %v1567_v14 = vpop.eup %1566  ;;  %v1163_v11 = vrot.slane %v1094_v41, %v1162_v54 }
 0x25d   :  { %v1085_v23 = vmul.f32 0.02, %v1067_v32  ;;  %v991_v30 = vmul.f32 0.6931472, %v1567_v14 }
 0x25e   :  { %v1165_v24 = vsel %vm1164_vm10, %v1163_v11, %v1158_v62 }
 0x25f   :  { %v1569_v58 = vpop.eup %1568  ;;  %v1172_v42 = vsel %vm1171_vm7, %v1170_v13, %v1165_v24  ;;  %v1101_v50 = vadd.f32 %v1085_v23, %v1005_v25  ;;  %v1007_v34 = vmul.f32 0.5, %v991_v30 }
 0x260   :  { %v1069_v54 = vmul.f32 0.6931472, %v1569_v58  ;;  %v1179_v18 = vsel %vm1178_vm3, %v1177_v36, %v1172_v42 }
 0x261   :  { %v1186_v31 = vsel %vm1185_vm14, %v1184_v15, %v1179_v18  ;;  %v1212_v45 = vrot.slane %v1101_v50, %v1211_v28 }
 0x262   :  { %v1086_v6 = vmul.f32 0.02, %v1069_v54  ;;  %v1193_v26 = vsel %vm1192_vm2, %v1191_v21, %v1186_v31 }
 0x263   :  { %v1571_v51 = vpop.eup %1570  ;;  %v1200_v49 = vsel %vm1199_vm15, %v1198_v38, %v1193_v26 }
 0x264   :  { %v1102_v55 = vadd.f32 %v1086_v6, %v1006_v0  ;;  %v1071_v44 = vmul.f32 0.6931472, %v1571_v51  ;;  %v1207_v33 = vsel %vm1206_vm0, %v1205_v43, %v1200_v49 }
 0x265   :  { %v1214_v56 = vsel %vm1213_vm12, %v1212_v45, %v1207_v33 }
 0x266   :  { %v1087_v1 = vmul.f32 0.02, %v1071_v44  ;;  %v1219_v3 = vrot.slane %v1102_v55, %v1218_v48 }
 0x268   :  { %v1103_v12 = vadd.f32 %v1087_v1, %v1007_v34  ;;  %v1221_v47 = vsel %vm1220_vm4, %v1219_v3, %v1214_v56 }
 0x26a   :  { %v1226_v10 = vrot.slane %v1103_v12, %v1225_v19 }
 0x26c   :  { %v1228_v29 = vsel %vm1227_vm13, %v1226_v10, %v1221_v47 }
 0x26d   :  { %1230 = vst [vmem:[#allocation12] sm:$0x1] %v1228_v29 }
 0x26e   :  { %1671 = shalt.err (!%p1668_p8)
}
 0x26f   :  { %s1672_s15 = scalar_lea.hbm %s2666_s4, 16 }
 0x270   :  { %p1673_p9 = scmp.ne.s32.totalorder %s2666_s4, %s1672_s15  ;;  %p1676_p10 = scmp.lt.u32.totalorder %s1672_s15, %s2666_s4 }
 0x272   :  { %p1678_p11 = pnand %p1676_p10, %p1673_p9 }
 0x274   :  { %1681 = shalt.err (!%p1678_p11)
}
 0x275   :  { %1240 = dma.vmem_to_hbm [thread:$0]  %s1238_s28, 16, %s2666_s4, [#allocation6]  }
 0x276   :  { %1688 = dma.done.wait [#allocation6], 16  }
 0x277   :  { %1689 = vsyncadd [#allocation6], 4294967280 }
 0x278   :  { %1244 = vsyncpa [#allocation5], 1 }
 0x279   :  { %1245 = vsyncpa [#allocation8], 1 }
 0x27a   :  { %1246 = vsyncpa [#allocation11], 1 }
 0x27b   :  { %1247 = vsyncpa [#allocation6], 1 }

</bundles_post_ra>
